<compile_context>
chip_gen: v7x
topology: tpu7x:2x2x1
jax: 0.10.0
libtpu: 0.0.40
codegen_flags: <defaults>
</compile_context>

<pallas_src>
import functools

import jax
import jax.numpy as jnp
from jax.experimental import pallas as pl
from jax.experimental.pallas import tpu as pltpu

# Small compat shim (older releases named this TPUCompilerParams).
_CompilerParams = getattr(pltpu, "CompilerParams", None) or getattr(
    pltpu, "TPUCompilerParams")

_LAYER_CFG = ((64, 2, 1), (128, 2, 2), (256, 2, 2), (512, 2, 2))
_CPAD = 128          # minimum activation channel width (lane-dense stores)
_VMEM_BUDGET = None


def _round_up(x, m):
    return ((x + m - 1) // m) * m


def _vmem_budget_bytes():
    """Scoped-VMEM budget derived from the detected chip (v5e/v6e: 128 MiB
    physical, v7x: 64 MiB); conservative fallback if the query fails."""
    global _VMEM_BUDGET
    if _VMEM_BUDGET is None:
        cap = None
        try:
            cap = getattr(pltpu.get_tpu_info(), "vmem_capacity_bytes", None)
        except Exception:
            cap = None
        if not cap:
            cap = 64 * 1024 * 1024
        _VMEM_BUDGET = int(max(16 * 1024 * 1024,
                               min(int(cap) // 2, 64 * 1024 * 1024)))
    return _VMEM_BUDGET


# ---------------------------------------------------------------------------
# Fused matmul kernels: out = act((x @ w) + bias [+ residual])
# (BN scale is pre-folded into the weight columns.)
# ---------------------------------------------------------------------------

def _matmul_bias_kernel_single_k(x_ref, w_ref, b_ref, *rest, relu,
                                 has_residual):
    """Whole contraction resident in one block: no accumulator scratch."""
    if has_residual:
        r_ref, o_ref = rest
    else:
        (o_ref,) = rest
    y = jnp.dot(x_ref[...], w_ref[...], preferred_element_type=jnp.float32)
    y = y + b_ref[...]
    if has_residual:
        y = y + r_ref[...].astype(jnp.float32)
    if relu:
        y = jnp.maximum(y, 0.0)
    o_ref[...] = y.astype(o_ref.dtype)


def _matmul_bias_kernel_acc(x_ref, w_ref, b_ref, *rest, relu, has_residual):
    """K tiled along the last grid axis; f32 VMEM accumulator."""
    if has_residual:
        r_ref, o_ref, acc_ref = rest
    else:
        o_ref, acc_ref = rest
    k = pl.program_id(2)

    @pl.when(k == 0)
    def _init():
        acc_ref[...] = jnp.zeros_like(acc_ref)

    acc_ref[...] += jnp.dot(x_ref[...], w_ref[...],
                            preferred_element_type=jnp.float32)

    @pl.when(k == pl.num_programs(2) - 1)
    def _epilogue():
        y = acc_ref[...] + b_ref[...]
        if has_residual:
            y = y + r_ref[...].astype(jnp.float32)
        if relu:
            y = jnp.maximum(y, 0.0)
        o_ref[...] = y.astype(o_ref.dtype)


def fused_matmul_bias(x, w, bias, *, residual=None, relu=False,
                      out_dtype=jnp.bfloat16,
                      max_tm=256, max_tn=256, max_tk=8192):
    """Tiled MXU matmul: act((x @ w) + bias [+ residual]).

    bf16 operands, f32 accumulation.  Non-divisible dims are zero-padded to
    the tile grid and the result is sliced back.
    """
    x = x.astype(jnp.bfloat16)
    w = w.astype(jnp.bfloat16)
    M, K = x.shape
    K2, N = w.shape
    assert K == K2, (K, K2)
    bias2 = bias.reshape(1, N).astype(jnp.float32)
    has_res = residual is not None
    if has_res:
        assert residual.shape == (M, N), (residual.shape, (M, N))
        residual = residual.astype(jnp.bfloat16)

    budget = _vmem_budget_bytes()

    # --- tile selection (tm 16-aligned for bf16 sublane packing) -----------
    if M <= max_tm:
        tm, Mp = M, M
    else:
        tm = max(16, (max_tm // 16) * 16)
        Mp = _round_up(M, tm)
    if N <= max_tn:
        tn, Np = N, N
    else:
        tn = max(128, (max_tn // 128) * 128)
        Np = _round_up(N, tn)
    # Keep the whole contraction resident when the double-buffered x/w blocks
    # fit the VMEM budget; otherwise tile K (multiple of 128) and zero-pad.
    tk_vmem = max(512, ((budget * 3 // 4) // (4 * (tm + tn)) // 128) * 128)
    eff_max_tk = min(max_tk, tk_vmem)
    if K <= eff_max_tk:
        tk, Kp = K, K
    else:
        tk = max(128, (eff_max_tk // 128) * 128)
        Kp = _round_up(K, tk)

    # --- zero padding to the tile grid --------------------------------------
    if (Mp, Kp) != (M, K):
        x = jnp.pad(x, ((0, Mp - M), (0, Kp - K)))
    if (Kp, Np) != (K, N):
        w = jnp.pad(w, ((0, Kp - K), (0, Np - N)))
    if Np != N:
        bias2 = jnp.pad(bias2, ((0, 0), (0, Np - N)))
    if has_res and (Mp, Np) != (M, N):
        residual = jnp.pad(residual, ((0, Mp - M), (0, Np - N)))

    gm, gn, gk = Mp // tm, Np // tn, Kp // tk

    bytes_accessed = (Mp * Kp + Kp * Np) * 2 + Mp * Np * jnp.dtype(out_dtype).itemsize
    if has_res:
        bytes_accessed += Mp * Np * 2
    cost = pl.CostEstimate(flops=2 * Mp * Np * Kp, transcendentals=0,
                           bytes_accessed=bytes_accessed)

    if gk == 1:
        # Fast path: no accumulator scratch, purely parallel 2-D grid.
        in_specs = [
            pl.BlockSpec((tm, tk), lambda i, j: (i, 0)),
            pl.BlockSpec((tk, tn), lambda i, j: (0, j)),
            pl.BlockSpec((1, tn), lambda i, j: (0, j)),
        ]
        args = [x, w, bias2]
        if has_res:
            in_specs.append(pl.BlockSpec((tm, tn), lambda i, j: (i, j)))
            args.append(residual)
        out = pl.pallas_call(
            functools.partial(_matmul_bias_kernel_single_k, relu=relu,
                              has_residual=has_res),
            out_shape=jax.ShapeDtypeStruct((Mp, Np), out_dtype),
            grid_spec=pltpu.PrefetchScalarGridSpec(
                num_scalar_prefetch=0,
                grid=(gm, gn),
                in_specs=in_specs,
                out_specs=pl.BlockSpec((tm, tn), lambda i, j: (i, j)),
            ),
            compiler_params=_CompilerParams(
                dimension_semantics=("parallel", "parallel"),
                vmem_limit_bytes=budget),
            cost_estimate=cost,
        )(*args)
    else:
        in_specs = [
            pl.BlockSpec((tm, tk), lambda i, j, k: (i, k)),
            pl.BlockSpec((tk, tn), lambda i, j, k: (k, j)),
            pl.BlockSpec((1, tn), lambda i, j, k: (0, j)),
        ]
        args = [x, w, bias2]
        if has_res:
            in_specs.append(pl.BlockSpec((tm, tn), lambda i, j, k: (i, j)))
            args.append(residual)
        out = pl.pallas_call(
            functools.partial(_matmul_bias_kernel_acc, relu=relu,
                              has_residual=has_res),
            out_shape=jax.ShapeDtypeStruct((Mp, Np), out_dtype),
            grid_spec=pltpu.PrefetchScalarGridSpec(
                num_scalar_prefetch=0,
                grid=(gm, gn, gk),
                in_specs=in_specs,
                out_specs=pl.BlockSpec((tm, tn), lambda i, j, k: (i, j)),
                scratch_shapes=[pltpu.VMEM((tm, tn), jnp.float32)],
            ),
            compiler_params=_CompilerParams(
                dimension_semantics=("parallel", "parallel", "arbitrary"),
                vmem_limit_bytes=budget),
            cost_estimate=cost,
        )(*args)

    if (Mp, Np) != (M, N):
        out = out[:M, :N]
    return out


# ---------------------------------------------------------------------------
# Conv / pool wrappers
# ---------------------------------------------------------------------------

def _im2col(x, kh, kw, stride, pad):
    """NHWC (bf16) -> (B*Ho*Wo, kh*kw*C) patches, (i, j, c) minor ordering."""
    B, H, W, C = x.shape
    if pad:
        x = jnp.pad(x, ((0, 0), (pad, pad), (pad, pad), (0, 0)))
    Ho = (H + 2 * pad - kh) // stride + 1
    Wo = (W + 2 * pad - kw) // stride + 1
    if kh == 1 and kw == 1:
        p = x[:, ::stride, ::stride, :]
    else:
        # TODO(synk): this kh*kw tap concat still materializes ~kh*kw x the
        # activation in HBM (bf16); removing it needs a direct-conv kernel
        # with element-offset tap windows (pl.Element / manual DMA).
        cols = []
        for i in range(kh):
            for j in range(kw):
                cols.append(x[:, i:i + stride * Ho:stride,
                              j:j + stride * Wo:stride, :])
        p = jnp.concatenate(cols, axis=-1)
    return p.reshape(B * Ho * Wo, kh * kw * C), Ho, Wo


def conv_bn(x, w, bias, *, stride, pad, relu, residual=None):
    """x: NHWC bf16, w: (kh,kw,Cin,Cout) bf16 with BN scale folded in."""
    kh, kw, cin, cout = w.shape
    B = x.shape[0]
    patches, Ho, Wo = _im2col(x, kh, kw, stride, pad)
    res2d = None
    if residual is not None:
        res2d = residual.reshape(B * Ho * Wo, cout)
    out = fused_matmul_bias(patches, w.reshape(kh * kw * cin, cout), bias,
                            residual=res2d, relu=relu)
    return out.reshape(B, Ho, Wo, cout)


def maxpool_3x3_s2_p1(x):
    # Deliberately left to XLA fusion — a pallas_call here would force all 9
    # strided tap tensors to be materialized in HBM as operands.
    B, H, W, C = x.shape
    Ho = (H + 2 - 3) // 2 + 1
    Wo = (W + 2 - 3) // 2 + 1
    xp = jnp.pad(x, ((0, 0), (1, 1), (1, 1), (0, 0)),
                 constant_values=-jnp.inf)
    out = None
    for i in range(3):
        for j in range(3):
            tap = jax.lax.slice(xp, (0, i, j, 0),
                                (B, i + 2 * Ho - 1, j + 2 * Wo - 1, C),
                                (1, 2, 2, 1))
            out = tap if out is None else jnp.maximum(out, tap)
    return out


# ---------------------------------------------------------------------------
# Parameters (deterministic init; BN eval-mode stats folded into w / bias)
# ---------------------------------------------------------------------------

def _bn_fold(c, eps=1e-5):
    # PyTorch BatchNorm2d eval defaults: gamma=1, beta=0, mean=0, var=1.
    gamma = jnp.ones((c,), jnp.float32)
    beta = jnp.zeros((c,), jnp.float32)
    mean = jnp.zeros((c,), jnp.float32)
    var = jnp.ones((c,), jnp.float32)
    scale = gamma * jax.lax.rsqrt(var + eps)
    bias = beta - mean * scale
    return scale, bias


def _conv_w(key, kh, kw, cin, cout):
    w = jax.random.normal(key, (kh, kw, cin, cout), jnp.float32) * 0.05
    return w.astype(jnp.bfloat16)


def _fold_scale_into_w(w, scale):
    return (w.astype(jnp.float32) * scale[None, None, None, :]).astype(jnp.bfloat16)


def _pad_channels(w, bias, cin_to=None, cout_to=None):
    """Zero-pad conv weight in/out channel dims (keeps math exact)."""
    kh, kw, cin, cout = w.shape
    cin_to = cin if cin_to is None else cin_to
    cout_to = cout if cout_to is None else cout_to
    w = jnp.pad(w, ((0, 0), (0, 0), (0, cin_to - cin), (0, cout_to - cout)))
    bias = jnp.pad(bias, (0, cout_to - cout))
    return w, bias


def _act_ch(c):
    return max(c, _CPAD)


def init_resnet18_params(key, num_classes=10):
    keys = iter(jax.random.split(key, 64))
    params = {}

    # Stem: 3 -> 64, cout zero-padded to 128 for lane-dense stores.
    w = _conv_w(next(keys), 7, 7, 3, 64)
    s, b = _bn_fold(64)
    w = _fold_scale_into_w(w, s)
    w, b = _pad_channels(w, b, cout_to=_act_ch(64))
    params["conv1"], params["b1"] = w, b

    in_c, in_c_pad = 64, _act_ch(64)
    layers = []
    for out_c, nblocks, stride in _LAYER_CFG:
        out_c_pad = _act_ch(out_c)
        blocks = []
        for bidx in range(nblocks):
            s_ = stride if bidx == 0 else 1
            blk = {}
            w1 = _conv_w(next(keys), 3, 3, in_c, out_c)
            s1, b1 = _bn_fold(out_c)
            w1 = _fold_scale_into_w(w1, s1)
            w1, b1 = _pad_channels(w1, b1, cin_to=in_c_pad, cout_to=out_c_pad)
            w2 = _conv_w(next(keys), 3, 3, out_c, out_c)
            s2, b2 = _bn_fold(out_c)
            w2 = _fold_scale_into_w(w2, s2)
            w2, b2 = _pad_channels(w2, b2, cin_to=out_c_pad, cout_to=out_c_pad)
            blk["conv1"], blk["b1"] = w1, b1
            blk["conv2"], blk["b2"] = w2, b2
            if s_ != 1 or in_c != out_c:
                wd = _conv_w(next(keys), 1, 1, in_c, out_c)
                sd, bd = _bn_fold(out_c)
                wd = _fold_scale_into_w(wd, sd)
                wd, bd = _pad_channels(wd, bd, cin_to=in_c_pad,
                                       cout_to=out_c_pad)
                blk["down_conv"], blk["down_b"] = wd, bd
            blocks.append(blk)
            in_c, in_c_pad = out_c, out_c_pad
        layers.append(blocks)
    params["layers"] = layers

    # FC weight/bias padded to 128 output lanes (dense stores, sliced after).
    n_pad = max(128, _round_up(num_classes, 128))
    fc_w = jax.random.normal(next(keys), (512, num_classes), jnp.float32) * 0.05
    params["fc_w"] = (jnp.zeros((512, n_pad), jnp.float32)
                      .at[:, :num_classes].set(fc_w).astype(jnp.bfloat16))
    params["fc_b"] = jnp.zeros((n_pad,), jnp.float32)
    return params


# ---------------------------------------------------------------------------
# Forward pass
# ---------------------------------------------------------------------------

def basic_block_forward(x, blk, stride):
    out = conv_bn(x, blk["conv1"], blk["b1"], stride=stride, pad=1, relu=True)
    if "down_conv" in blk:
        identity = conv_bn(x, blk["down_conv"], blk["down_b"],
                           stride=stride, pad=0, relu=False)
    else:
        identity = x
    # Residual add + ReLU fused into the second conv's matmul epilogue.
    return conv_bn(out, blk["conv2"], blk["b2"], stride=1, pad=1,
                   relu=True, residual=identity)


def resnet_forward(params, x_nchw, num_classes=10):
    # NCHW -> NHWC; activations kept in bf16 (f32 accumulation in matmuls).
    x = jnp.transpose(x_nchw, (0, 2, 3, 1)).astype(jnp.bfloat16)
    x = conv_bn(x, params["conv1"], params["b1"], stride=2, pad=3, relu=True)
    x = maxpool_3x3_s2_p1(x)
    for layer_idx, blocks in enumerate(params["layers"]):
        for blk_idx, blk in enumerate(blocks):
            stride = _LAYER_CFG[layer_idx][2] if blk_idx == 0 else 1
            x = basic_block_forward(x, blk, stride)
    # Global avg pool + flatten: tiny reduction, left to XLA fusion (a
    # pallas_call here is pure launch overhead for ~KB of work).
    x = jnp.mean(x.astype(jnp.float32), axis=(1, 2))            # (B, 512)
    # TODO(synk): Dropout(0.5) is identity in eval mode; training-mode random
    # masking is not implemented here.
    logits = fused_matmul_bias(x.astype(jnp.bfloat16), params["fc_w"],
                               params["fc_b"], relu=False,
                               out_dtype=jnp.float32)
    return logits[:, :num_classes]


if __name__ == "__main__":
    key = jax.random.PRNGKey(0)
    k_params, k_x, k_a, k_b, k_c, k_d, k_e, k_f = jax.random.split(key, 8)

    # --- self-check 1: single-K fast path (bias + residual + ReLU) ---------
    xm = (jax.random.normal(k_a, (256, 640), jnp.float32) * 0.5).astype(jnp.bfloat16)
    wm = (jax.random.normal(k_b, (640, 128), jnp.float32) * 0.05).astype(jnp.bfloat16)
    bi = jnp.linspace(-0.5, 0.5, 128).astype(jnp.float32)
    rs = (jax.random.normal(k_c, (256, 128), jnp.float32) * 0.5).astype(jnp.bfloat16)
    got = fused_matmul_bias(xm, wm, bi, residual=rs, relu=True,
                            out_dtype=jnp.float32)
    want = jnp.maximum(
        jnp.dot(xm, wm, preferred_element_type=jnp.float32) + bi
        + rs.astype(jnp.float32), 0.0)
    err = float(jnp.max(jnp.abs(got - want)))
    assert err < 2e-2, f"single-K fused matmul mismatch: {err}"

    # --- self-check 2: K-tiled accumulator path with cdiv padding ----------
    xm2 = (jax.random.normal(k_d, (200, 1000), jnp.float32) * 0.5).astype(jnp.bfloat16)
    wm2 = (jax.random.normal(k_e, (1000, 300), jnp.float32) * 0.05).astype(jnp.bfloat16)
    bi2 = jnp.linspace(-0.2, 0.2, 300).astype(jnp.float32)
    rs2 = (jax.random.normal(k_f, (200, 300), jnp.float32) * 0.5).astype(jnp.bfloat16)
    got2 = fused_matmul_bias(xm2, wm2, bi2, residual=rs2, relu=True,
                             out_dtype=jnp.float32,
                             max_tm=64, max_tn=128, max_tk=256)
    want2 = jnp.maximum(
        jnp.dot(xm2, wm2, preferred_element_type=jnp.float32) + bi2
        + rs2.astype(jnp.float32), 0.0)
    err2 = float(jnp.max(jnp.abs(got2 - want2)))
    assert err2 < 2e-2, f"K-tiled fused matmul mismatch: {err2}"

    # --- full ResNet-18 forward ---------------------------------------------
    params = init_resnet18_params(k_params, num_classes=10)
    # Small CIFAR-like NCHW input consistent with num_classes=10.
    x = jax.random.normal(k_x, (2, 3, 32, 32), jnp.float32)
    fwd = jax.jit(functools.partial(resnet_forward, num_classes=10))
    out = jax.block_until_ready(fwd(params, x))
    assert out.shape == (2, 10), out.shape
    assert bool(jnp.all(jnp.isfinite(out)))
    print("KERNEL_OK")
</pallas_src>

<mosaic_0001>
module attributes {stable_mosaic.version = 11 : i64} {
  func.func @_matmul_bias_kernel_single_k(%arg0: i32, %arg1: i32, %arg2: memref<256x640xbf16, #tpu.memory_space<vmem>>, %arg3: memref<640x128xbf16, #tpu.memory_space<vmem>>, %arg4: memref<1x128xf32, #tpu.memory_space<vmem>>, %arg5: memref<256x128xbf16, #tpu.memory_space<vmem>>, %arg6: memref<256x128xf32, #tpu.memory_space<vmem>>) attributes {dimension_semantics = [#tpu.dimension_semantics<parallel>, #tpu.dimension_semantics<parallel>], iteration_bounds = array<i64: 1, 1>, scalar_prefetch = 0 : i64, scratch_operands = 0 : i64, tpu.core_type = #tpu.core_type<tc>, window_params = [{transform_indices = @transform_0, window_bounds = array<i64: 256, 640>}, {transform_indices = @transform_1, window_bounds = array<i64: 640, 128>}, {transform_indices = @transform_2, window_bounds = array<i64: 1, 128>}, {transform_indices = @transform_3, window_bounds = array<i64: 256, 128>}, {transform_indices = @transform_4, window_bounds = array<i64: 256, 128>}]} {
    %c0 = arith.constant 0 : index
    %c0_0 = arith.constant 0 : index
    %0 = vector.load %arg2[%c0, %c0_0] : memref<256x640xbf16, #tpu.memory_space<vmem>>, vector<256x640xbf16>
    %c0_1 = arith.constant 0 : index
    %c0_2 = arith.constant 0 : index
    %1 = vector.load %arg3[%c0_1, %c0_2] : memref<640x128xbf16, #tpu.memory_space<vmem>>, vector<640x128xbf16>
    %cst = arith.constant dense<0.000000e+00> : vector<256x128xf32>
    %2 = tpu.matmul %0, %1, %cst {dimension_numbers = #tpu.dot_dimension_numbers<[1], [0], [0], [1], [0, 0, 1, 1], [], []>} : vector<256x640xbf16>, vector<640x128xbf16>, vector<256x128xf32> -> vector<256x128xf32>
    %c0_3 = arith.constant 0 : index
    %c0_4 = arith.constant 0 : index
    %3 = vector.load %arg4[%c0_3, %c0_4] : memref<1x128xf32, #tpu.memory_space<vmem>>, vector<1x128xf32>
    %4 = vector.broadcast %3 : vector<1x128xf32> to vector<256x128xf32>
    %5 = arith.addf %2, %4 : vector<256x128xf32>
    %c0_5 = arith.constant 0 : index
    %c0_6 = arith.constant 0 : index
    %6 = vector.load %arg5[%c0_5, %c0_6] : memref<256x128xbf16, #tpu.memory_space<vmem>>, vector<256x128xbf16>
    %7 = arith.extf %6 : vector<256x128xbf16> to vector<256x128xf32>
    %8 = arith.addf %5, %7 : vector<256x128xf32>
    %cst_7 = arith.constant 0.000000e+00 : f32
    %9 = vector.broadcast %cst_7 : f32 to vector<256x128xf32>
    %10 = arith.maximumf %8, %9 : vector<256x128xf32>
    %c0_8 = arith.constant 0 : index
    %c0_9 = arith.constant 0 : index
    %11 = vector.load %arg6[%c0_8, %c0_9] : memref<256x128xf32, #tpu.memory_space<vmem>>, vector<256x128xf32>
    tpu.vector_store %arg6[%c0_8, %c0_9], %10 {strides = array<i32>} : memref<256x128xf32, #tpu.memory_space<vmem>>, vector<256x128xf32>,
    return
  }
  func.func @transform_0(%arg0: i32, %arg1: i32) -> (i32, i32) {
    %c0_i32 = arith.constant 0 : i32
    %c0_i32_0 = arith.constant 0 : i32
    return %arg0, %c0_i32 : i32, i32
  }
  func.func @transform_1(%arg0: i32, %arg1: i32) -> (i32, i32) {
    %c0_i32 = arith.constant 0 : i32
    %c0_i32_0 = arith.constant 0 : i32
    return %c0_i32, %arg1 : i32, i32
  }
  func.func @transform_2(%arg0: i32, %arg1: i32) -> (i32, i32) {
    %c0_i32 = arith.constant 0 : i32
    %c0_i32_0 = arith.constant 0 : i32
    return %c0_i32, %arg1 : i32, i32
  }
  func.func @transform_3(%arg0: i32, %arg1: i32) -> (i32, i32) {
    %c0_i32 = arith.constant 0 : i32
    return %arg0, %arg1 : i32, i32
  }
  func.func @transform_4(%arg0: i32, %arg1: i32) -> (i32, i32) {
    %c0_i32 = arith.constant 0 : i32
    return %arg0, %arg1 : i32, i32
  }
}

</mosaic_0001>

<bundles_post_ra>
// kernel: tpu_custom_call.1
= control target key start
LH: loop header
LB: loop body
LE: loop exit
PB: predicated region body
PF: predicated region fallthrough
CT: control target
= control target key end

     0   :  { %9 = vsyncpa [#allocation3], 0  ;;  %s2571_s0 = inlined_call_operand.hbm [shape: bf16[256,640], index: 0, kind: input, shape index: {}]   ;;  %s2572_s1 = inlined_call_operand.hbm [shape: bf16[640,128], index: 1, kind: input, shape index: {}]   ;;  %s2573_s2 = inlined_call_operand.vmem [shape: f32[1,128], index: 2, kind: input, shape index: {}]   ;;  %s2574_s3 = inlined_call_operand.hbm [shape: bf16[256,128], index: 3, kind: input, shape index: {}]   ;;  %s2575_s4 = inlined_call_operand.hbm [shape: f32[256,128], index: 4, kind: output, shape index: {}]  }
   0x1   :  { %10 = vsyncpa [#allocation6], 0 }
   0x2   :  { %11 = vsyncpa [#allocation4], 0  ;;  %s2328_s15 = smov [#allocation5]   ;;  %s2234_s19 = scalar_lea.hbm %s2572_s1, 5120 }
   0x3   :  { %s29_s16 = sshll.u32 %s2328_s15, 4  ;;  %p2235_p0 = scmp.ne.s32.totalorder %s2572_s1, %s2234_s19  ;;  %s30_s16 = int_to_ptr.vmem [resolvable:$true] %s29_s16 }
   0x4   :  { %p2238_p1 = scmp.lt.u32.totalorder %s2234_s19, %s2572_s1 }
   0x6   :  { %p2240_p2 = pnand %p2238_p1, %p2235_p0 }
   0x8   :  { %2243 = shalt.err (!%p2240_p2)
}
   0x9   :  { %s2244_s24 = scalar_lea.vmem %s30_s16, 5120  ;;  %p2249_p4 = scmp.lt.s32.totalorder %s30_s16, %s30_s16 }
   0xa   :  { %p2245_p3 = scmp.ne.s32.totalorder %s30_s16, %s2244_s24  ;;  %p2250_p5 = scmp.lt.s32.totalorder %s2244_s24, %s2244_s24 }
   0xc   :  { %p2251_p6 = por %p2250_p5, %p2249_p4 }
   0xe   :  { %p2252_p7 = pnand %p2251_p6, %p2245_p3 }
  0x10   :  { %2255 = shalt.err (!%p2252_p7)
}
  0x11   :  { %s2329_s25 = smov 64   ;;  %s2330_s26 = smov 4  }
  0x12   :  { %35 = dma.hbm_to_vmem [thread:$0]  %s2572_s1, 5120, %s30_s16, [#allocation6], %s2329_s25, %s2329_s25, %s2330_s26  }
  0x13   :  { %s2331_s29 = smov [#allocation2]   ;;  %s2256_s7 = scalar_lea.hbm %s2571_s0, 10240 }
  0x14   :  { %s17_s30 = sshll.u32 %s2331_s29, 4  ;;  %p2257_p8 = scmp.ne.s32.totalorder %s2571_s0, %s2256_s7  ;;  %s18_s30 = int_to_ptr.vmem [resolvable:$true] %s17_s30 }
  0x15   :  { %p2260_p9 = scmp.lt.u32.totalorder %s2256_s7, %s2571_s0 }
  0x17   :  { %p2262_p10 = pnand %p2260_p9, %p2257_p8 }
  0x19   :  { %2265 = shalt.err (!%p2262_p10)
}
  0x1a   :  { %s2266_s12 = scalar_lea.vmem %s18_s30, 10240  ;;  %p2271_p12 = scmp.lt.s32.totalorder %s18_s30, %s18_s30 }
  0x1b   :  { %p2267_p11 = scmp.ne.s32.totalorder %s18_s30, %s2266_s12  ;;  %p2272_p13 = scmp.lt.s32.totalorder %s2266_s12, %s2266_s12 }
  0x1d   :  { %p2273_p0 = por %p2272_p13, %p2271_p12 }
  0x1f   :  { %p2274_p1 = pnand %p2273_p0, %p2267_p11 }
  0x21   :  { %2277 = shalt.err (!%p2274_p1)
}
  0x22   :  { %s2332_s1 = smov 320   ;;  %s2333_s13 = smov 20  }
  0x23   :  { %23 = dma.hbm_to_vmem [thread:$0]  %s2571_s0, 10240, %s18_s30, [#allocation3], %s2332_s1, %s2332_s1, %s2333_s13  }
  0x24   :  { %s2334_s16 = smov [#allocation7]   ;;  %s2278_s20 = scalar_lea.hbm %s2574_s3, 2048 }
  0x25   :  { %s43_s17 = sshll.u32 %s2334_s16, 4  ;;  %p2279_p2 = scmp.ne.s32.totalorder %s2574_s3, %s2278_s20  ;;  %s44_s17 = int_to_ptr.vmem [resolvable:$true] %s43_s17 }
  0x26   :  { %p2282_p3 = scmp.lt.u32.totalorder %s2278_s20, %s2574_s3 }
  0x28   :  { %p2284_p4 = pnand %p2282_p3, %p2279_p2 }
  0x2a   :  { %2287 = shalt.err (!%p2284_p4)
}
  0x2b   :  { %s2288_s27 = scalar_lea.vmem %s44_s17, 2048  ;;  %p2293_p6 = scmp.lt.s32.totalorder %s44_s17, %s44_s17 }
  0x2c   :  { %p2289_p5 = scmp.ne.s32.totalorder %s44_s17, %s2288_s27  ;;  %p2294_p7 = scmp.lt.s32.totalorder %s2288_s27, %s2288_s27 }
  0x2e   :  { %p2295_p8 = por %p2294_p7, %p2293_p6 }
  0x30   :  { %p2296_p9 = pnand %p2295_p8, %p2289_p5 }
  0x32   :  { %2299 = shalt.err (!%p2296_p9)
}
  0x33   :  { %49 = dma.hbm_to_vmem [thread:$0]  %s2574_s3, 2048, %s44_s17, [#allocation6], %s2329_s25, %s2329_s25, %s2330_s26  }
  0x34   :  { %2322 = dma.done.wait [#allocation3], 10240  }
  0x35   :  { %2323 = vsyncadd [#allocation3], 4294957056 }
  0x36   :  { %2324 = dma.done.wait [#allocation6], 7168  }
  0x37   :  { %2325 = vsyncadd [#allocation6], 4294960128  ;;  %v2082_v0 = vld [vmem:[#allocation5 + $0x40] sm:$0xff]   ;;  %v2084_v2 = vld [vmem:[#allocation5 + $0x48] sm:$0xff]  }
  0x38   :  { %v2083_v1 = vld [vmem:[#allocation5] sm:$0xff]   ;;  %1760 = vmatprep.subr.bf16.mxu0 %v2082_v0  ;;  %2056 = vmatprep.subr.bf16.mxu1 %v2082_v0  ;;  %v2085_v3 = vld [vmem:[#allocation5 + $0x8] sm:$0xff]   ;;  %v2086_v4 = vld [vmem:[#allocation5 + $0x50] sm:$0xff]  }
  0x39   :  { %1761 = vmatpush3.bf16.msra.mxu0 %v2083_v1  ;;  %2064 = vmatpush3.bf16.msra.mxu1 %v2083_v1  ;;  %v2087_v5 = vld [vmem:[#allocation5 + $0x10] sm:$0xff]   ;;  %v2088_v6 = vld [vmem:[#allocation5 + $0x58] sm:$0xff]   ;;  %v2090_v8 = vld [vmem:[#allocation5 + $0x60] sm:$0xff]  }
  0x3a   :  { %1762 = vmatprep.subr.bf16.mxu0 %v2084_v2  ;;  %2057 = vmatprep.subr.bf16.mxu1 %v2084_v2  ;;  %v2089_v7 = vld [vmem:[#allocation5 + $0x18] sm:$0xff]   ;;  %v2091_v9 = vld [vmem:[#allocation5 + $0x20] sm:$0xff]   ;;  %v2092_v10 = vld [vmem:[#allocation5 + $0x68] sm:$0xff]  }
  0x3b   :  { %v2100_v11 = vld [vmem:[#allocation2 + $0x4] ss:$20 sps:$4 sm:$0xff]   ;;  %v2093_v13 = vld [vmem:[#allocation5 + $0x28] sm:$0xff]   ;;  %v2094_v14 = vld [vmem:[#allocation5 + $0x70] sm:$0xff]  }
  0x3c   :  { %v2103_v12 = vld [vmem:[#allocation2 + $0x1e4] ss:$20 sps:$4 sm:$0xff]   ;;  %931 = vmatprep.mubr.bf16.mxu0 %v2100_v11  ;;  %v2095_v15 = vld [vmem:[#allocation5 + $0x30] sm:$0xff]   ;;  %v2106_v23 = vld [vmem:[#allocation5 + $0xc8] sm:$0xff]  }
  0x3d   :  { %1763 = vmatpush3.bf16.msra.mxu0 %v2085_v3  ;;  %2065 = vmatpush3.bf16.msra.mxu1 %v2085_v3  ;;  %v2096_v16 = vld [vmem:[#allocation5 + $0x78] sm:$0xff]   ;;  %v2104_v18 = vld [vmem:[#allocation5 + $0xc0] sm:$0xff]   ;;  %v2126_v26 = vld [vmem:[#allocation5 + $0x108] sm:$0xff]  }
  0x3e   :  { %1764 = vmatprep.subr.bf16.mxu0 %v2086_v4  ;;  %2058 = vmatprep.subr.bf16.mxu1 %v2086_v4  ;;  %v2097_v17 = vld [vmem:[#allocation5 + $0x38] sm:$0xff]   ;;  %v2107_v19 = vld [vmem:[#allocation5 + $0x100] sm:$0xff]   ;;  %v2108_v27 = vld [vmem:[#allocation5 + $0x88] sm:$0xff]  }
  0x3f   :  { %1027 = vmatprep.mubr.bf16.mxu1 %v2103_v12  ;;  %v2098_v20 = vld [vmem:[#allocation2] ss:$20 sps:$4 sm:$0xff]   ;;  %v2113_v28 = vld [vmem:[#allocation2 + $0x28] ss:$20 sps:$4 sm:$0xff]   ;;  %v2123_v37 = vld [vmem:[#allocation2 + $0x50] ss:$20 sps:$4 sm:$0xff]  }
  0x40   :  { %v2101_v21 = vld [vmem:[#allocation2 + $0x1e0] ss:$20 sps:$4 sm:$0xff]   ;;  %v2114_v30 = vld [vmem:[#allocation2 + $0x208] ss:$20 sps:$4 sm:$0xff]   ;;  %v2124_v39 = vld [vmem:[#allocation2 + $0x230] ss:$20 sps:$4 sm:$0xff]  }
  0x41   :  { %1765 = vmatpush3.bf16.msra.mxu0 %v2087_v5  ;;  %2066 = vmatpush3.bf16.msra.mxu1 %v2087_v5  ;;  %v2105_v22 = vld [vmem:[#allocation5 + $0x80] sm:$0xff]   ;;  %v2115_v29 = vld [vmem:[#allocation5 + $0xd0] sm:$0xff]   ;;  %v2117_v33 = vld [vmem:[#allocation5 + $0xd8] sm:$0xff]  }
  0x42   :  { %1766 = vmatprep.subr.bf16.mxu0 %v2088_v6  ;;  %2059 = vmatprep.subr.bf16.mxu1 %v2088_v6  ;;  %v2109_v24 = vld [vmem:[#allocation2 + $0x2c] ss:$20 sps:$4 sm:$0xff]   ;;  %v2116_v31 = vld [vmem:[#allocation5 + $0x90] sm:$0xff]   ;;  %v2118_v35 = vld [vmem:[#allocation5 + $0x98] sm:$0xff]  }
  0x43   :  { %v2111_v25 = vld [vmem:[#allocation2 + $0x20c] ss:$20 sps:$4 sm:$0xff]   ;;  %v2119_v32 = vld [vmem:[#allocation2 + $0x54] ss:$20 sps:$4 sm:$0xff]   ;;  %v2130_v42 = vld [vmem:[#allocation2 + $0x7c] ss:$20 sps:$4 sm:$0xff]  }
  0x44   :  { %v2121_v34 = vld [vmem:[#allocation2 + $0x234] ss:$20 sps:$4 sm:$0xff]   ;;  %v2125_v36 = vld [vmem:[#allocation5 + $0xe0] sm:$0xff]   ;;  %v2132_v43 = vld [vmem:[#allocation2 + $0x25c] ss:$20 sps:$4 sm:$0xff]  }
  0x45   :  { %1767 = vmatpush3.bf16.msra.mxu0 %v2089_v7  ;;  %2067 = vmatpush3.bf16.msra.mxu1 %v2089_v7  ;;  %v2139_v38 = vld [vmem:[#allocation5 + $0x110] sm:$0xff]   ;;  %v2127_v40 = vld [vmem:[#allocation5 + $0xa0] sm:$0xff]   ;;  %v2128_v41 = vld [vmem:[#allocation5 + $0xe8] sm:$0xff]  }
  0x46   :  { %1768 = vmatprep.subr.bf16.mxu0 %v2090_v8  ;;  %2060 = vmatprep.subr.bf16.mxu1 %v2090_v8  ;;  %v2129_v44 = vld [vmem:[#allocation5 + $0xa8] sm:$0xff]   ;;  %v2153_v45 = vld [vmem:[#allocation5 + $0x118] sm:$0xff]   ;;  %v2136_v48 = vld [vmem:[#allocation5 + $0xf0] sm:$0xff]  }
  0x47   :  { %v2134_v46 = vld [vmem:[#allocation2 + $0x78] ss:$20 sps:$4 sm:$0xff]   ;;  %v2137_v49 = vld [vmem:[#allocation5 + $0xb0] sm:$0xff]   ;;  %v2160_v52 = vld [vmem:[#allocation5 + $0x120] sm:$0xff]  }
  0x48   :  { %v2135_v47 = vld [vmem:[#allocation2 + $0x258] ss:$20 sps:$4 sm:$0xff]   ;;  %v2143_v55 = vld [vmem:[#allocation2 + $0x8] ss:$20 sps:$4 sm:$0xff]   ;;  %v2146_v56 = vld [vmem:[#allocation2 + $0xa0] ss:$20 sps:$4 sm:$0xff]  }
  0x49   :  { %1769 = vmatpush3.bf16.msra.mxu0 %v2091_v9  ;;  %2068 = vmatpush3.bf16.msra.mxu1 %v2091_v9  ;;  %v2138_v50 = vld [vmem:[#allocation5 + $0xf8] sm:$0xff]   ;;  %v2145_v53 = vld [vmem:[#allocation2 + $0xc] ss:$20 sps:$4 sm:$0xff]   ;;  %v2149_v59 = vld [vmem:[#allocation2 + $0x34] ss:$20 sps:$4 sm:$0xff]  }
  0x4a   :  { %1770 = vmatprep.subr.bf16.mxu0 %v2092_v10  ;;  %2061 = vmatprep.subr.bf16.mxu1 %v2092_v10  ;;  %v2141_v51 = vld [vmem:[#allocation2 + $0xa4] ss:$20 sps:$4 sm:$0xff]   ;;  %v2173_v57 = vld [vmem:[#allocation5 + $0x128] sm:$0xff]   ;;  %v2180_v60 = vld [vmem:[#allocation5 + $0x130] sm:$0xff]  }
  0x4b   :  { %v2140_v54 = vld [vmem:[#allocation5 + $0xb8] sm:$0xff]   ;;  %v2147_v58 = vld [vmem:[#allocation2 + $0xcc] ss:$20 sps:$4 sm:$0xff]   ;;  %v2152_v62 = vld [vmem:[#allocation2 + $0x30] ss:$20 sps:$4 sm:$0xff]  }
  0x4c   :  { %v2151_v61 = vld [vmem:[#allocation2 + $0xc8] ss:$20 sps:$4 sm:$0xff]   ;;  %v2158_v2 = vld [vmem:[#allocation2 + $0xf0] ss:$20 sps:$4 sm:$0xff]   ;;  %v2159_v3 = vld [vmem:[#allocation2 + $0x58] ss:$20 sps:$4 sm:$0xff]  }
  0x4d   :  { %1771 = vmatpush3.bf16.msra.mxu0 %v2093_v13  ;;  %2069 = vmatpush3.bf16.msra.mxu1 %v2093_v13  ;;  %v2154_v63 = vld [vmem:[#allocation2 + $0xf4] ss:$20 sps:$4 sm:$0xff]   ;;  %v2156_v0 = vld [vmem:[#allocation2 + $0x5c] ss:$20 sps:$4 sm:$0xff]   ;;  %v2163_v5 = vld [vmem:[#allocation2 + $0x84] ss:$20 sps:$4 sm:$0xff]  }
  0x4e   :  { %1772 = vmatprep.subr.bf16.mxu0 %v2094_v14  ;;  %2062 = vmatprep.subr.bf16.mxu1 %v2094_v14  ;;  %v2193_v1 = vld [vmem:[#allocation5 + $0x138] sm:$0xff]   ;;  %v2166_v7 = vld [vmem:[#allocation2 + $0x80] ss:$20 sps:$4 sm:$0xff]  }
  0x4f   :  { %v2161_v4 = vld [vmem:[#allocation2 + $0x11c] ss:$20 sps:$4 sm:$0xff]   ;;  %v2165_v6 = vld [vmem:[#allocation2 + $0x118] ss:$20 sps:$4 sm:$0xff]   ;;  %v2171_v10 = vld [vmem:[#allocation2 + $0x140] ss:$20 sps:$4 sm:$0xff]  }
  0x50   :  { %v2167_v8 = vld [vmem:[#allocation2 + $0x144] ss:$20 sps:$4 sm:$0xff]   ;;  %v2169_v9 = vld [vmem:[#allocation2 + $0xac] ss:$20 sps:$4 sm:$0xff]   ;;  %v2172_v11 = vld [vmem:[#allocation2 + $0xa8] ss:$20 sps:$4 sm:$0xff]  }
  0x51   :  { %1773 = vmatpush3.bf16.msra.mxu0 %v2095_v15  ;;  %2070 = vmatpush3.bf16.msra.mxu1 %v2095_v15  ;;  %v2174_v12 = vld [vmem:[#allocation2 + $0x16c] ss:$20 sps:$4 sm:$0xff]   ;;  %v2176_v13 = vld [vmem:[#allocation2 + $0xd4] ss:$20 sps:$4 sm:$0xff]   ;;  %v2179_v15 = vld [vmem:[#allocation2 + $0xd0] ss:$20 sps:$4 sm:$0xff]  }
  0x52   :  { %1774 = vmatprep.subr.bf16.mxu0 %v2096_v16  ;;  %2063 = vmatprep.subr.bf16.mxu1 %v2096_v16  ;;  %v2178_v14 = vld [vmem:[#allocation2 + $0x168] ss:$20 sps:$4 sm:$0xff]  }
  0x53   :  { %v2181_v16 = vld [vmem:[#allocation2 + $0x194] ss:$20 sps:$4 sm:$0xff]  }
  0x55   :  { %1775 = vmatpush3.bf16.msra.mxu0 %v2097_v17  ;;  %2071 = vmatpush3.bf16.msra.mxu1 %v2097_v17  ;;  %v2183_v17 = vld [vmem:[#allocation2 + $0xfc] ss:$20 sps:$4 sm:$0xff]  }
  0x56   :  { %1872 = vmatprep.subr.bf16.mxu1 %v2104_v18  ;;  %2008 = vmatprep.subr.bf16.mxu0 %v2107_v19  ;;  %v2185_v18 = vld [vmem:[#allocation2 + $0x190] ss:$20 sps:$4 sm:$0xff]  }
  0x58   :  { %932 = vmatmul.mubr.bf16.vlgmr.msra.gmra.mrb[0].mxu0 %v2098_v20  ;;  %1028 = vmatmul.mubr.bf16.vlgmr.msra.gmra.mrb[0].mxu1 %v2101_v21  ;;  %v2187_v20 = vld [vmem:[#allocation2 + $0x1bc] ss:$20 sps:$4 sm:$0xff]   ;;  %v2189_v21 = vld [vmem:[#allocation2 + $0x124] ss:$20 sps:$4 sm:$0xff]  }
  0x59   :  { %1873 = vmatpush3.bf16.msra.mxu1 %v2105_v22  ;;  %2009 = vmatpush3.bf16.msra.mxu0 %v2107_v19  ;;  %v2186_v19 = vld [vmem:[#allocation2 + $0xf8] ss:$20 sps:$4 sm:$0xff]  }
  0x5a   :  { %1874 = vmatprep.subr.bf16.mxu1 %v2106_v23  ;;  %939 = vmatprep.mubr.bf16.mxu0 %v2109_v24  ;;  %v2191_v22 = vld [vmem:[#allocation2 + $0x1b8] ss:$20 sps:$4 sm:$0xff]   ;;  %v2192_v23 = vld [vmem:[#allocation2 + $0x120] ss:$20 sps:$4 sm:$0xff]  }
  0x5b   :  { %1035 = vmatprep.mubr.bf16.mxu1 %v2111_v25  ;;  %2010 = vmatprep.subr.bf16.mxu0 %v2126_v26  ;;  %v2194_v24 = vld [vmem:[#allocation2 + $0x14c] ss:$20 sps:$4 sm:$0xff]   ;;  %v2196_v25 = vld [vmem:[#allocation2 + $0x10] ss:$20 sps:$4 sm:$0xff]  }
  0x5d   :  { %1875 = vmatpush3.bf16.msra.mxu1 %v2108_v27  ;;  %2011 = vmatpush3.bf16.msra.mxu0 %v2126_v26  ;;  %v2197_v26 = vld [vmem:[#allocation2 + $0x148] ss:$20 sps:$4 sm:$0xff]   ;;  %v2198_v27 = vld [vmem:[#allocation2 + $0x38] ss:$20 sps:$4 sm:$0xff]  }
  0x5e   :  { %1876 = vmatprep.subr.bf16.mxu1 %v2115_v29  ;;  %2012 = vmatprep.subr.bf16.mxu0 %v2139_v38  ;;  %v2201_v29 = vld [vmem:[#allocation2 + $0x60] ss:$20 sps:$4 sm:$0xff]  }
  0x60   :  { %940 = vmatmul.mubr.bf16.gmra.mrb[4].mxu0 %v2113_v28  ;;  %1036 = vmatmul.mubr.bf16.gmra.mrb[4].mxu1 %v2114_v30  ;;  %v2199_v28 = vld [vmem:[#allocation2 + $0x174] ss:$20 sps:$4 sm:$0xff]   ;;  %v2202_v30 = vld [vmem:[#allocation2 + $0x170] ss:$20 sps:$4 sm:$0xff]  }
  0x61   :  { %1877 = vmatpush3.bf16.msra.mxu1 %v2116_v31  ;;  %947 = vmatprep.mubr.bf16.mxu0 %v2119_v32  ;;  %v2203_v31 = vld [vmem:[#allocation2 + $0x88] ss:$20 sps:$4 sm:$0xff]  }
  0x62   :  { %1878 = vmatprep.subr.bf16.mxu1 %v2117_v33  ;;  %1043 = vmatprep.mubr.bf16.mxu1 %v2121_v34  ;;  %v2204_v32 = vld [vmem:[#allocation2 + $0x19c] ss:$20 sps:$4 sm:$0xff]   ;;  %v2207_v34 = vld [vmem:[#allocation2 + $0x198] ss:$20 sps:$4 sm:$0xff]  }
  0x63   :  { %2013 = vmatpush3.bf16.msra.mxu0 %v2139_v38  ;;  %v2206_v33 = vld [vmem:[#allocation2 + $0xb0] ss:$20 sps:$4 sm:$0xff]   ;;  %v2212_v38 = vld [vmem:[#allocation2 + $0x1c0] ss:$20 sps:$4 sm:$0xff]  }
  0x64   :  { %2014 = vmatprep.subr.bf16.mxu0 %v2153_v45 }
  0x65   :  { %1879 = vmatpush3.bf16.msra.mxu1 %v2118_v35  ;;  %v2208_v35 = vld [vmem:[#allocation2 + $0xd8] ss:$20 sps:$4 sm:$0xff]  }
  0x66   :  { %1880 = vmatprep.subr.bf16.mxu1 %v2125_v36  ;;  %v2209_v36 = vld [vmem:[#allocation2 + $0x1c4] ss:$20 sps:$4 sm:$0xff]  }
  0x67   :  { %2015 = vmatpush3.bf16.msra.mxu0 %v2153_v45  ;;  %v2221_v45 = vld [vmem:[#allocation2 + $0x1a0] ss:$20 sps:$4 sm:$0xff]  }
  0x68   :  { %948 = vmatmul.mubr.bf16.gmra.mrb[8].mxu0 %v2123_v37  ;;  %1044 = vmatmul.mubr.bf16.gmra.mrb[8].mxu1 %v2124_v39  ;;  %v2211_v37 = vld [vmem:[#allocation2 + $0x100] ss:$20 sps:$4 sm:$0xff]   ;;  %v2213_v39 = vld [vmem:[#allocation2 + $0x128] ss:$20 sps:$4 sm:$0xff]  }
  0x69   :  { %1881 = vmatpush3.bf16.msra.mxu1 %v2127_v40  ;;  %955 = vmatprep.mubr.bf16.mxu0 %v2130_v42  ;;  %v2214_v40 = vld [vmem:[#allocation2 + $0x1ec] ss:$20 sps:$4 sm:$0xff]   ;;  %v2217_v42 = vld [vmem:[#allocation2 + $0x1e8] ss:$20 sps:$4 sm:$0xff]  }
  0x6a   :  { %1882 = vmatprep.subr.bf16.mxu1 %v2128_v41  ;;  %1051 = vmatprep.mubr.bf16.mxu1 %v2132_v43  ;;  %v2216_v41 = vld [vmem:[#allocation2 + $0x150] ss:$20 sps:$4 sm:$0xff]   ;;  %v2218_v43 = vld [vmem:[#allocation2 + $0x178] ss:$20 sps:$4 sm:$0xff]  }
  0x6b   :  { %2016 = vmatprep.subr.bf16.mxu0 %v2160_v52 }
  0x6c   :  { %2017 = vmatpush3.bf16.msra.mxu0 %v2160_v52  ;;  %v2229_v52 = vld [vmem:[#allocation2 + $0x264] ss:$20 sps:$4 sm:$0xff]  }
  0x6d   :  { %1883 = vmatpush3.bf16.msra.mxu1 %v2129_v44  ;;  %2018 = vmatprep.subr.bf16.mxu0 %v2173_v57  ;;  %v2219_v44 = vld [vmem:[#allocation2 + $0x214] ss:$20 sps:$4 sm:$0xff]  }
  0x6e   :  { %1884 = vmatprep.subr.bf16.mxu1 %v2136_v48  ;;  %v2224_v48 = vld [vmem:[#allocation2 + $0x23c] ss:$20 sps:$4 sm:$0xff]  }
  0x70   :  { %956 = vmatmul.mubr.bf16.gmra.mrb[12].mxu0 %v2134_v46  ;;  %1052 = vmatmul.mubr.bf16.gmra.mrb[12].mxu1 %v2135_v47  ;;  %v2222_v46 = vld [vmem:[#allocation2 + $0x210] ss:$20 sps:$4 sm:$0xff]   ;;  %v2223_v47 = vld [vmem:[#allocation2 + $0x1c8] ss:$20 sps:$4 sm:$0xff]  }
  0x71   :  { %1885 = vmatpush3.bf16.msra.mxu1 %v2137_v49  ;;  %963 = vmatprep.mubr.bf16.mxu0 %v2141_v51  ;;  %v2226_v49 = vld [vmem:[#allocation2 + $0x1f0] ss:$20 sps:$4 sm:$0xff]   ;;  %v2228_v51 = vld [vmem:[#allocation2 + $0x218] ss:$20 sps:$4 sm:$0xff]  }
  0x72   :  { %1886 = vmatprep.subr.bf16.mxu1 %v2138_v50  ;;  %1092 = vmatprep.mubr.bf16.mxu1 %v2145_v53  ;;  %v2227_v50 = vld [vmem:[#allocation2 + $0x238] ss:$20 sps:$4 sm:$0xff]   ;;  %v2231_v53 = vld [vmem:[#allocation2 + $0x240] ss:$20 sps:$4 sm:$0xff]  }
  0x73   :  { %2019 = vmatpush3.bf16.msra.mxu0 %v2173_v57 }
  0x74   :  { %2020 = vmatprep.subr.bf16.mxu0 %v2180_v60 }
  0x75   :  { %1887 = vmatpush3.bf16.msra.mxu1 %v2140_v54  ;;  %v2232_v54 = vld [vmem:[#allocation2 + $0x260] ss:$20 sps:$4 sm:$0xff]  }
  0x77   :  { %2021 = vmatpush3.bf16.msra.mxu0 %v2180_v60 }
  0x78   :  { %964 = vmatmul.mubr.bf16.gmra.mrb[16].mxu0 %v2146_v56  ;;  %1093 = vmatmul.mubr.bf16.vlgmr.msra.gmra.mrb[16].mxu1 %v2143_v55  ;;  %v2233_v55 = vld [vmem:[#allocation2 + $0x268] ss:$20 sps:$4 sm:$0xff]  }
  0x79   :  { %971 = vmatprep.mubr.bf16.mxu0 %v2147_v58  ;;  %1100 = vmatprep.mubr.bf16.mxu1 %v2149_v59 }
  0x7a   :  { %2022 = vmatprep.subr.bf16.mxu0 %v2193_v1 }
  0x7b   :  { %2023 = vmatpush3.bf16.msra.mxu0 %v2193_v1 }
  0x80   :  { %972 = vmatmul.mubr.bf16.gmra.mrb[20].mxu0 %v2151_v61  ;;  %1101 = vmatmul.mubr.bf16.gmra.mrb[20].mxu1 %v2152_v62 }
  0x81   :  { %979 = vmatprep.mubr.bf16.mxu0 %v2154_v63  ;;  %1108 = vmatprep.mubr.bf16.mxu1 %v2156_v0 }
  0x88   :  { %980 = vmatmul.mubr.bf16.gmra.mrb[24].mxu0 %v2158_v2  ;;  %1109 = vmatmul.mubr.bf16.gmra.mrb[24].mxu1 %v2159_v3 }
  0x89   :  { %987 = vmatprep.mubr.bf16.mxu0 %v2161_v4  ;;  %1116 = vmatprep.mubr.bf16.mxu1 %v2163_v5 }
  0x90   :  { %988 = vmatmul.mubr.bf16.gmra.mrb[28].mxu0 %v2165_v6  ;;  %1117 = vmatmul.mubr.bf16.gmra.mrb[28].mxu1 %v2166_v7 }
  0x91   :  { %995 = vmatprep.mubr.bf16.mxu0 %v2167_v8  ;;  %1124 = vmatprep.mubr.bf16.mxu1 %v2169_v9 }
  0x98   :  { %996 = vmatmul.mubr.bf16.gmra.mrb[32].mxu0 %v2171_v10  ;;  %1125 = vmatmul.mubr.bf16.gmra.mrb[32].mxu1 %v2172_v11 }
  0x99   :  { %1003 = vmatprep.mubr.bf16.mxu0 %v2174_v12  ;;  %1132 = vmatprep.mubr.bf16.mxu1 %v2176_v13 }
  0xa0   :  { %1004 = vmatmul.mubr.bf16.gmra.mrb[36].mxu0 %v2178_v14  ;;  %1133 = vmatmul.mubr.bf16.gmra.mrb[36].mxu1 %v2179_v15 }
  0xa1   :  { %1011 = vmatprep.mubr.bf16.mxu0 %v2181_v16  ;;  %1140 = vmatprep.mubr.bf16.mxu1 %v2183_v17 }
  0xa8   :  { %1012 = vmatmul.mubr.bf16.gmra.mrb[40].mxu0 %v2185_v18  ;;  %1141 = vmatmul.mubr.bf16.gmra.mrb[40].mxu1 %v2186_v19 }
  0xa9   :  { %1019 = vmatprep.mubr.bf16.mxu0 %v2187_v20  ;;  %1148 = vmatprep.mubr.bf16.mxu1 %v2189_v21 }
  0xb0   :  { %1020 = vmatmul.mubr.bf16.gmra.mrb[44].mxu0 %v2191_v22  ;;  %1149 = vmatmul.mubr.bf16.gmra.mrb[44].mxu1 %v2192_v23 }
  0xb1   :  { %1156 = vmatprep.mubr.bf16.mxu1 %v2194_v24  ;;  %2024 = vmatprep.mubr.bf16.mxu0 %v2196_v25 }
  0xb8   :  { %1157 = vmatmul.mubr.bf16.gmra.mrb[48].mxu1 %v2197_v26  ;;  %2025 = vmatmul.mubr.bf16.vlgmr.msra.gmra.mrb[48].mxu0 %v2198_v27 }
  0xb9   :  { %1164 = vmatprep.mubr.bf16.mxu1 %v2199_v28  ;;  %2028 = vmatprep.mubr.bf16.mxu0 %v2201_v29 }
  0xc0   :  { %1165 = vmatmul.mubr.bf16.gmra.mrb[52].mxu1 %v2202_v30  ;;  %2029 = vmatmul.mubr.bf16.gmra.mrb[52].mxu0 %v2203_v31 }
  0xc1   :  { %1172 = vmatprep.mubr.bf16.mxu1 %v2204_v32  ;;  %2032 = vmatprep.mubr.bf16.mxu0 %v2206_v33 }
  0xc8   :  { %1173 = vmatmul.mubr.bf16.gmra.mrb[56].mxu1 %v2207_v34  ;;  %2033 = vmatmul.mubr.bf16.gmra.mrb[56].mxu0 %v2208_v35 }
  0xc9   :  { %1180 = vmatprep.mubr.bf16.mxu1 %v2209_v36  ;;  %2036 = vmatprep.mubr.bf16.mxu0 %v2211_v37 }
  0xd0   :  { %1181 = vmatmul.mubr.bf16.gmra.mrb[60].mxu1 %v2212_v38  ;;  %2037 = vmatmul.mubr.bf16.gmra.mrb[60].mxu0 %v2213_v39 }
  0xd1   :  { %1188 = vmatprep.mubr.bf16.mxu1 %v2214_v40  ;;  %2040 = vmatprep.mubr.bf16.mxu0 %v2216_v41 }
  0xd8   :  { %1189 = vmatmul.mubr.bf16.gmra.mrb[64].mxu1 %v2217_v42  ;;  %2041 = vmatmul.mubr.bf16.gmra.mrb[64].mxu0 %v2218_v43  ;;  %v2424_v42 = vld [vmem:[%s2573_s2] ss:$0 sm:$0xff]  ;;  %s2335_s2 = smov [#allocation8]  }
  0xd9   :  { %1196 = vmatprep.mubr.bf16.mxu1 %v2219_v44  ;;  %2044 = vmatprep.mubr.bf16.mxu0 %v2221_v45  ;;  %s1547_s26 = sshll.u32 %s2335_s2, 4  ;;  %s1548_s26 = int_to_ptr.vmem [resolvable:$true] %s1547_s26 }
  0xda   :  { %s2300_s29 = scalar_lea.vmem %s1548_s26, 4096  ;;  %p2305_p11 = scmp.lt.s32.totalorder %s1548_s26, %s1548_s26 }
  0xdb   :  { %p2301_p10 = scmp.ne.s32.totalorder %s1548_s26, %s2300_s29  ;;  %p2306_p12 = scmp.lt.s32.totalorder %s2300_s29, %s2300_s29 }
  0xdd   :  { %p2307_p13 = por %p2306_p12, %p2305_p11 }
  0xdf   :  { %p2308_p0 = pnand %p2307_p13, %p2301_p10 }
  0xe0   :  { %1197 = vmatmul.mubr.bf16.gmra.mrb[68].mxu1 %v2222_v46  ;;  %2045 = vmatmul.mubr.bf16.gmra.mrb[68].mxu0 %v2223_v47 }
  0xe1   :  { %1204 = vmatprep.mubr.bf16.mxu1 %v2224_v48  ;;  %2048 = vmatprep.mubr.bf16.mxu0 %v2226_v49 }
  0xe8   :  { %1205 = vmatmul.mubr.bf16.gmra.mrb[72].mxu1 %v2227_v50  ;;  %2049 = vmatmul.mubr.bf16.gmra.mrb[72].mxu0 %v2228_v51 }
  0xe9   :  { %1212 = vmatprep.mubr.bf16.mxu1 %v2229_v52  ;;  %2052 = vmatprep.mubr.bf16.mxu0 %v2231_v53 }
  0xf0   :  { %1213 = vmatmul.mubr.bf16.gmra.mrb[76].mxu1 %v2232_v54  ;;  %2053 = vmatmul.mubr.bf16.gmra.mrb[76].mxu0 %v2233_v55 }
 0x12b   :  { %v1848_v56 = vpop.f32.mrb[0].mxu1  ;;  %v1776_v57 = vpop.f32.mrb[0].mxu0 }
 0x12c   :  { %v1849_v58 = vpop.f32.mrb[1].mxu1  ;;  %v1777_v59 = vpop.f32.mrb[1].mxu0 }
 0x12d   :  { %v2405_v60 = vadd.f32 %v1849_v58, %v1848_v56  ;;  %v1851_v61 = vpop.f32.mrb[2].mxu1  ;;  %v1778_v62 = vadd.f32 %v1777_v59, %v1776_v57  ;;  %v1779_v63 = vpop.f32.mrb[2].mxu0 }
 0x12e   :  { %v1852_v0 = vpop.f32.mrb[3].mxu1  ;;  %v1780_v1 = vpop.f32.mrb[3].mxu0 }
 0x12f   :  { %v2407_v2 = vadd.f32 %v1852_v0, %v1851_v61  ;;  %v1781_v3 = vadd.f32 %v1780_v1, %v1779_v63  ;;  %v934_v45 = vadd.f32 %v1778_v62, %v2424_v42 }
 0x131   :  { %v937_v52 = vadd.f32 %v1781_v3, %v2424_v42 }
 0x133   :  { %v1854_v4 = vpop.f32.mrb[4].mxu1  ;;  %v1782_v5 = vpop.f32.mrb[4].mxu0 }
 0x134   :  { %v1855_v6 = vpop.f32.mrb[5].mxu1  ;;  %v1783_v7 = vpop.f32.mrb[5].mxu0 }
 0x135   :  { %v2409_v8 = vadd.f32 %v1855_v6, %v1854_v4  ;;  %v1857_v9 = vpop.f32.mrb[6].mxu1  ;;  %v1784_v10 = vadd.f32 %v1783_v7, %v1782_v5  ;;  %v1785_v11 = vpop.f32.mrb[6].mxu0 }
 0x136   :  { %v1858_v12 = vpop.f32.mrb[7].mxu1  ;;  %v1786_v13 = vpop.f32.mrb[7].mxu0 }
 0x137   :  { %v2411_v14 = vadd.f32 %v1858_v12, %v1857_v9  ;;  %v1787_v15 = vadd.f32 %v1786_v13, %v1785_v11  ;;  %v942_v62 = vadd.f32 %v1784_v10, %v2424_v42 }
 0x139   :  { %v945_v3 = vadd.f32 %v1787_v15, %v2424_v42 }
 0x13b   :  { %v1860_v16 = vpop.f32.mrb[8].mxu1  ;;  %v1788_v17 = vpop.f32.mrb[8].mxu0 }
 0x13c   :  { %v1861_v18 = vpop.f32.mrb[9].mxu1  ;;  %v1789_v19 = vpop.f32.mrb[9].mxu0 }
 0x13d   :  { %v2413_v20 = vadd.f32 %v1861_v18, %v1860_v16  ;;  %v1863_v21 = vpop.f32.mrb[10].mxu1  ;;  %v1790_v22 = vadd.f32 %v1789_v19, %v1788_v17  ;;  %v1791_v23 = vpop.f32.mrb[10].mxu0 }
 0x13e   :  { %v1864_v24 = vpop.f32.mrb[11].mxu1  ;;  %v1792_v25 = vpop.f32.mrb[11].mxu0 }
 0x13f   :  { %v2415_v26 = vadd.f32 %v1864_v24, %v1863_v21  ;;  %v1793_v27 = vadd.f32 %v1792_v25, %v1791_v23  ;;  %v950_v10 = vadd.f32 %v1790_v22, %v2424_v42 }
 0x141   :  { %v953_v15 = vadd.f32 %v1793_v27, %v2424_v42 }
 0x143   :  { %v1866_v28 = vpop.f32.mrb[12].mxu1  ;;  %v1794_v29 = vpop.f32.mrb[12].mxu0 }
 0x144   :  { %v1867_v30 = vpop.f32.mrb[13].mxu1  ;;  %v1795_v31 = vpop.f32.mrb[13].mxu0 }
 0x145   :  { %v2417_v32 = vadd.f32 %v1867_v30, %v1866_v28  ;;  %v1869_v33 = vpop.f32.mrb[14].mxu1  ;;  %v1796_v34 = vadd.f32 %v1795_v31, %v1794_v29  ;;  %v1797_v35 = vpop.f32.mrb[14].mxu0 }
 0x146   :  { %v1870_v36 = vpop.f32.mrb[15].mxu1  ;;  %v1798_v37 = vpop.f32.mrb[15].mxu0 }
 0x147   :  { %v2419_v38 = vadd.f32 %v1870_v36, %v1869_v33  ;;  %v1799_v39 = vadd.f32 %v1798_v37, %v1797_v35  ;;  %v958_v22 = vadd.f32 %v1796_v34, %v2424_v42 }
 0x149   :  { %v961_v27 = vadd.f32 %v1799_v39, %v2424_v42 }
 0x14b   :  { %v1888_v40 = vpop.f32.mrb[16].mxu1  ;;  %v1800_v41 = vpop.f32.mrb[16].mxu0 }
 0x14c   :  { %v1889_v43 = vpop.f32.mrb[17].mxu1  ;;  %v1801_v44 = vpop.f32.mrb[17].mxu0 }
 0x14d   :  { %v1890_v46 = vadd.f32 %v1889_v43, %v1888_v40  ;;  %v1891_v47 = vpop.f32.mrb[18].mxu1  ;;  %v1802_v48 = vadd.f32 %v1801_v44, %v1800_v41  ;;  %v1803_v49 = vpop.f32.mrb[18].mxu0 }
 0x14e   :  { %v1892_v50 = vpop.f32.mrb[19].mxu1  ;;  %v1804_v51 = vpop.f32.mrb[19].mxu0 }
 0x14f   :  { %v1893_v53 = vadd.f32 %v1892_v50, %v1891_v47  ;;  %v1805_v54 = vadd.f32 %v1804_v51, %v1803_v49  ;;  %v2428_v55 = vadd.f32 %v1890_v46, %v934_v45  ;;  %v966_v34 = vadd.f32 %v1802_v48, %v2424_v42 }
 0x151   :  { %v2430_v56 = vadd.f32 %v1893_v53, %v937_v52  ;;  %v969_v39 = vadd.f32 %v1805_v54, %v2424_v42 }
 0x153   :  { %v1894_v57 = vpop.f32.mrb[20].mxu1  ;;  %v1806_v58 = vpop.f32.mrb[20].mxu0 }
 0x154   :  { %v1895_v59 = vpop.f32.mrb[21].mxu1  ;;  %v1807_v61 = vpop.f32.mrb[21].mxu0 }
 0x155   :  { %v1896_v63 = vadd.f32 %v1895_v59, %v1894_v57  ;;  %v1897_v0 = vpop.f32.mrb[22].mxu1  ;;  %v1808_v1 = vadd.f32 %v1807_v61, %v1806_v58  ;;  %v1809_v4 = vpop.f32.mrb[22].mxu0 }
 0x156   :  { %v1898_v5 = vpop.f32.mrb[23].mxu1  ;;  %v1810_v6 = vpop.f32.mrb[23].mxu0 }
 0x157   :  { %v1899_v7 = vadd.f32 %v1898_v5, %v1897_v0  ;;  %v1811_v9 = vadd.f32 %v1810_v6, %v1809_v4  ;;  %v2434_v11 = vadd.f32 %v1896_v63, %v942_v62 }
 0x159   :  { %v2436_v12 = vadd.f32 %v1899_v7, %v945_v3 }
 0x15b   :  { %v1900_v13 = vpop.f32.mrb[24].mxu1  ;;  %v1812_v16 = vpop.f32.mrb[24].mxu0 }
 0x15c   :  { %v1901_v17 = vpop.f32.mrb[25].mxu1  ;;  %v1813_v18 = vpop.f32.mrb[25].mxu0 }
 0x15d   :  { %v1902_v19 = vadd.f32 %v1901_v17, %v1900_v13  ;;  %v1903_v21 = vpop.f32.mrb[26].mxu1  ;;  %v1814_v23 = vadd.f32 %v1813_v18, %v1812_v16  ;;  %v1815_v24 = vpop.f32.mrb[26].mxu0 }
 0x15e   :  { %v1904_v25 = vpop.f32.mrb[27].mxu1  ;;  %v1816_v28 = vpop.f32.mrb[27].mxu0 }
 0x15f   :  { %v1905_v29 = vadd.f32 %v1904_v25, %v1903_v21  ;;  %v1817_v30 = vadd.f32 %v1816_v28, %v1815_v24  ;;  %v2440_v31 = vadd.f32 %v1902_v19, %v950_v10  ;;  %v974_v10 = vadd.f32 %v1808_v1, %v2424_v42 }
 0x161   :  { %v2442_v33 = vadd.f32 %v1905_v29, %v953_v15  ;;  %v977_v15 = vadd.f32 %v1811_v9, %v2424_v42 }
 0x163   :  { %v1906_v35 = vpop.f32.mrb[28].mxu1  ;;  %v1818_v36 = vpop.f32.mrb[28].mxu0 }
 0x164   :  { %v1907_v37 = vpop.f32.mrb[29].mxu1  ;;  %v1819_v40 = vpop.f32.mrb[29].mxu0 }
 0x165   :  { %v1908_v41 = vadd.f32 %v1907_v37, %v1906_v35  ;;  %v1909_v43 = vpop.f32.mrb[30].mxu1  ;;  %v1820_v44 = vadd.f32 %v1819_v40, %v1818_v36  ;;  %v1821_v45 = vpop.f32.mrb[30].mxu0 }
 0x166   :  { %v1910_v46 = vpop.f32.mrb[31].mxu1  ;;  %v1822_v47 = vpop.f32.mrb[31].mxu0 }
 0x167   :  { %v1911_v49 = vadd.f32 %v1910_v46, %v1909_v43  ;;  %v1823_v50 = vadd.f32 %v1822_v47, %v1821_v45  ;;  %v2446_v51 = vadd.f32 %v1908_v41, %v958_v22  ;;  %v982_v43 = vadd.f32 %v1814_v23, %v2424_v42 }
 0x169   :  { %v2448_v52 = vadd.f32 %v1911_v49, %v961_v27 }
 0x16b   :  { %v1912_v53 = vpop.f32.mrb[32].mxu1  ;;  %v1824_v57 = vpop.f32.mrb[32].mxu0 }
 0x16c   :  { %v1913_v58 = vpop.f32.mrb[33].mxu1  ;;  %v1825_v59 = vpop.f32.mrb[33].mxu0 }
 0x16d   :  { %v1914_v61 = vadd.f32 %v1913_v58, %v1912_v53  ;;  %v1915_v62 = vpop.f32.mrb[34].mxu1  ;;  %v2451_v63 = vadd.f32 %v1825_v59, %v1824_v57  ;;  %v1827_v0 = vpop.f32.mrb[34].mxu0  ;;  %v985_v53 = vadd.f32 %v1817_v30, %v2424_v42 }
 0x16e   :  { %v1916_v4 = vpop.f32.mrb[35].mxu1  ;;  %v1828_v5 = vpop.f32.mrb[35].mxu0 }
 0x16f   :  { %v1917_v6 = vadd.f32 %v1916_v4, %v1915_v62  ;;  %v2454_v3 = vadd.f32 %v1828_v5, %v1827_v0  ;;  %v2456_v7 = vadd.f32 %v1914_v61, %v966_v34  ;;  %v990_v4 = vadd.f32 %v1820_v44, %v2424_v42 }
 0x171   :  { %v2458_v13 = vadd.f32 %v1917_v6, %v969_v39 }
 0x173   :  { %v1918_v16 = vpop.f32.mrb[36].mxu1  ;;  %v1830_v17 = vpop.f32.mrb[36].mxu0 }
 0x174   :  { %v1919_v18 = vpop.f32.mrb[37].mxu1  ;;  %v1831_v48 = vpop.f32.mrb[37].mxu0 }
 0x175   :  { %v1920_v19 = vadd.f32 %v1919_v18, %v1918_v16  ;;  %v1921_v21 = vpop.f32.mrb[38].mxu1  ;;  %v2461_v24 = vadd.f32 %v1831_v48, %v1830_v17  ;;  %v1833_v25 = vpop.f32.mrb[38].mxu0  ;;  %v993_v18 = vadd.f32 %v1823_v50, %v2424_v42  ;;  %v998_v50 = vadd.f32 %v2451_v63, %v2424_v42 }
 0x176   :  { %v1922_v28 = vpop.f32.mrb[39].mxu1  ;;  %v1834_v54 = vpop.f32.mrb[39].mxu0 }
 0x177   :  { %v1923_v29 = vadd.f32 %v1922_v28, %v1921_v21  ;;  %v2464_v35 = vadd.f32 %v1834_v54, %v1833_v25  ;;  %v2466_v36 = vadd.f32 %v1920_v19, %v974_v10  ;;  %v1745_v19 = vld [vmem:[#allocation7 + $0x8] sm:$0xff]   ;;  %v1682_v25 = vld [vmem:[#allocation7] sm:$0xff]  }
 0x178   :  { %v1687_v54 = vunpack.c.l.bf16 %v1745_v19 }
 0x179   :  { %v2468_v37 = vadd.f32 %v1923_v29, %v977_v15  ;;  %v1683_v29 = vunpack.c.l.bf16 %v1682_v25 }
 0x17b   :  { %v1924_v40 = vpop.f32.mrb[40].mxu1  ;;  %v1836_v22 = vpop.f32.mrb[40].mxu0 }
 0x17c   :  { %v1925_v41 = vpop.f32.mrb[41].mxu1  ;;  %v1837_v1 = vpop.f32.mrb[41].mxu0 }
 0x17d   :  { %v1926_v45 = vadd.f32 %v1925_v41, %v1924_v40  ;;  %v1927_v46 = vpop.f32.mrb[42].mxu1  ;;  %v2471_v47 = vadd.f32 %v1837_v1, %v1836_v22  ;;  %v1839_v27 = vpop.f32.mrb[42].mxu0  ;;  %v1688_v1 = vunpack.c.h.bf16 %v1745_v19 }
 0x17e   :  { %v1928_v49 = vpop.f32.mrb[43].mxu1  ;;  %v1840_v9 = vpop.f32.mrb[43].mxu0 }
 0x17f   :  { %v1929_v57 = vadd.f32 %v1928_v49, %v1927_v46  ;;  %v2474_v58 = vadd.f32 %v1840_v9, %v1839_v27  ;;  %v2476_v59 = vadd.f32 %v1926_v45, %v982_v43  ;;  %v1684_v49 = vunpack.c.h.bf16 %v1682_v25 }
 0x180   :  { %v1001_v9 = vadd.f32 %v2454_v3, %v2424_v42 }
 0x181   :  { %v2478_v34 = vadd.f32 %v1929_v57, %v985_v53 }
 0x183   :  { %v1930_v61 = vpop.f32.mrb[44].mxu1  ;;  %v1842_v62 = vpop.f32.mrb[44].mxu0 }
 0x184   :  { %v1931_v0 = vpop.f32.mrb[45].mxu1  ;;  %v1843_v23 = vpop.f32.mrb[45].mxu0 }
 0x185   :  { %v1932_v5 = vadd.f32 %v1931_v0, %v1930_v61  ;;  %v1933_v39 = vpop.f32.mrb[46].mxu1  ;;  %v2481_v6 = vadd.f32 %v1843_v23, %v1842_v62  ;;  %v1845_v16 = vpop.f32.mrb[46].mxu0 }
 0x186   :  { %v1934_v17 = vpop.f32.mrb[47].mxu1  ;;  %v1846_v30 = vpop.f32.mrb[47].mxu0 }
 0x187   :  { %v1935_v48 = vadd.f32 %v1934_v17, %v1933_v39  ;;  %v2484_v10 = vadd.f32 %v1846_v30, %v1845_v16  ;;  %v2486_v21 = vadd.f32 %v1932_v5, %v990_v4  ;;  %v1747_v4 = vld [vmem:[#allocation7 + $0x18] sm:$0xff]   ;;  %v1746_v39 = vld [vmem:[#allocation7 + $0x10] sm:$0xff]  }
 0x188   :  { %v1691_v25 = vunpack.c.l.bf16 %v1746_v39 }
 0x189   :  { %v2488_v28 = vadd.f32 %v1935_v48, %v993_v18  ;;  %v1695_v18 = vunpack.c.l.bf16 %v1747_v4 }
 0x18b   :  { %v1936_v44 = vpop.f32.mrb[48].mxu1  ;;  %v2026_v15 = vpop.f32.mrb[48].mxu0 }
 0x18c   :  { %v1264_v40 = vadd.f32 %v2026_v15, %v2434_v11  ;;  %v1937_v22 = vpop.f32.mrb[49].mxu1  ;;  %v1255_v41 = vpop.f32.mrb[49].mxu0  ;;  %v1696_v15 = vunpack.c.h.bf16 %v1747_v4 }
 0x18d   :  { %v1938_v43 = vadd.f32 %v1937_v22, %v1936_v44  ;;  %v1256_v45 = vadd.f32 %v1255_v41, %v2428_v55  ;;  %v1939_v46 = vpop.f32.mrb[50].mxu1  ;;  %v2027_v27 = vpop.f32.mrb[50].mxu0 }
 0x18e   :  { %v1448_v53 = vadd.f32 %v1687_v54, %v1264_v40  ;;  %v1267_v57 = vadd.f32 %v2027_v27, %v2436_v12  ;;  %v1940_v61 = vpop.f32.mrb[51].mxu1  ;;  %v1258_v11 = vpop.f32.mrb[51].mxu0 }
 0x18f   :  { %v1446_v62 = vadd.f32 %v1683_v29, %v1256_v45  ;;  %v1941_v0 = vadd.f32 %v1940_v61, %v1939_v46  ;;  %v1259_v23 = vadd.f32 %v1258_v11, %v2430_v56  ;;  %v2498_v63 = vadd.f32 %v1938_v43, %v998_v50  ;;  %v1748_v11 = vld [vmem:[#allocation7 + $0x20] sm:$0xff]  }
 0x190   :  { %v1480_v5 = vmax.f32 %v1448_v53, 0.0  ;;  %v1449_v55 = vadd.f32 %v1688_v1, %v1267_v57  ;;  %v1006_v29 = vadd.f32 %v2461_v24, %v2424_v42  ;;  %v1692_v50 = vunpack.c.h.bf16 %v1746_v39  ;;  %v1749_v24 = vld [vmem:[#allocation7 + $0x28] sm:$0xff]  }
 0x191   :  { %v1478_v16 = vmax.f32 %v1446_v62, 0.0  ;;  %v1447_v17 = vadd.f32 %v1684_v49, %v1259_v23  ;;  %v2500_v30 = vadd.f32 %v1941_v0, %v1001_v9  ;;  %v1009_v43 = vadd.f32 %v2464_v35, %v2424_v42 }
 0x192   :  { %1512 = vst [vmem:[#allocation8 + $0x10] sm:$0xff] %v1480_v5  ;;  %v1481_v3 = vmax.f32 %v1449_v55, 0.0  ;;  %v1703_v4 = vunpack.c.l.bf16 %v1749_v24  ;;  %v1699_v39 = vunpack.c.l.bf16 %v1748_v11 }
 0x193   :  { %1510 = vst [vmem:[#allocation8] sm:$0xff] %v1478_v16  ;;  %v1479_v12 = vmax.f32 %v1447_v17, 0.0  ;;  %v1942_v48 = vpop.f32.mrb[52].mxu1  ;;  %v2030_v19 = vpop.f32.mrb[52].mxu0 }
 0x194   :  { %1513 = vst [vmem:[#allocation8 + $0x18] sm:$0xff] %v1481_v3  ;;  %v1280_v56 = vadd.f32 %v2030_v19, %v2446_v51  ;;  %v1943_v54 = vpop.f32.mrb[53].mxu1  ;;  %v1271_v44 = vpop.f32.mrb[53].mxu0  ;;  %v1704_v3 = vunpack.c.h.bf16 %v1749_v24 }
 0x195   :  { %1511 = vst [vmem:[#allocation8 + $0x8] sm:$0xff] %v1479_v12  ;;  %v1944_v40 = vadd.f32 %v1943_v54, %v1942_v48  ;;  %v1272_v22 = vadd.f32 %v1271_v44, %v2440_v31  ;;  %v1945_v41 = vpop.f32.mrb[54].mxu1  ;;  %v2031_v1 = vpop.f32.mrb[54].mxu0  ;;  %v1017_v54 = vadd.f32 %v2474_v58, %v2424_v42 }
 0x196   :  { %v1452_v45 = vadd.f32 %v1695_v18, %v1280_v56  ;;  %v1283_v46 = vadd.f32 %v2031_v1, %v2448_v52  ;;  %v1946_v51 = vpop.f32.mrb[55].mxu1  ;;  %v1274_v27 = vpop.f32.mrb[55].mxu0  ;;  %v1014_v18 = vadd.f32 %v2471_v47, %v2424_v42  ;;  %v1700_v56 = vunpack.c.h.bf16 %v1748_v11  ;;  %v1751_v47 = vld [vmem:[#allocation7 + $0x38] sm:$0xff]  }
 0x197   :  { %v1450_v49 = vadd.f32 %v1691_v25, %v1272_v22  ;;  %v1947_v9 = vadd.f32 %v1946_v51, %v1945_v41  ;;  %v1275_v53 = vadd.f32 %v1274_v27, %v2442_v33  ;;  %v2510_v57 = vadd.f32 %v1944_v40, %v1006_v29 }
 0x198   :  { %v1484_v61 = vmax.f32 %v1452_v45, 0.0  ;;  %v1453_v31 = vadd.f32 %v1696_v15, %v1283_v46  ;;  %v1711_v27 = vunpack.c.l.bf16 %v1751_v47  ;;  %v1022_v11 = vadd.f32 %v2481_v6, %v2424_v42  ;;  %v1753_v6 = vld [vmem:[#allocation7 + $0x48] sm:$0xff]  }
 0x199   :  { %v1482_v62 = vmax.f32 %v1450_v49, 0.0  ;;  %v1451_v0 = vadd.f32 %v1692_v50, %v1275_v53  ;;  %v2512_v23 = vadd.f32 %v1947_v9, %v1009_v43  ;;  %v1750_v43 = vld [vmem:[#allocation7 + $0x30] sm:$0xff]  }
 0x19a   :  { %1516 = vst [vmem:[#allocation8 + $0x30] sm:$0xff] %v1484_v61  ;;  %v1485_v35 = vmax.f32 %v1453_v31, 0.0  ;;  %v1707_v53 = vunpack.c.l.bf16 %v1750_v43  ;;  %v1712_v31 = vunpack.c.h.bf16 %v1751_v47 }
 0x19b   :  { %1514 = vst [vmem:[#allocation8 + $0x20] sm:$0xff] %v1482_v62  ;;  %v1483_v52 = vmax.f32 %v1451_v0, 0.0  ;;  %v1948_v5 = vpop.f32.mrb[56].mxu1  ;;  %v2034_v55 = vpop.f32.mrb[56].mxu0 }
 0x19c   :  { %1517 = vst [vmem:[#allocation8 + $0x38] sm:$0xff] %v1485_v35  ;;  %v1296_v33 = vadd.f32 %v2034_v55, %v2466_v36  ;;  %v1949_v16 = vpop.f32.mrb[57].mxu1  ;;  %v1287_v17 = vpop.f32.mrb[57].mxu0 }
 0x19d   :  { %1515 = vst [vmem:[#allocation8 + $0x28] sm:$0xff] %v1483_v52  ;;  %v1950_v12 = vadd.f32 %v1949_v16, %v1948_v5  ;;  %v1288_v48 = vadd.f32 %v1287_v17, %v2456_v7  ;;  %v1951_v19 = vpop.f32.mrb[58].mxu1  ;;  %v2035_v25 = vpop.f32.mrb[58].mxu0  ;;  %v1708_v52 = vunpack.c.h.bf16 %v1750_v43  ;;  %v1025_v5 = vadd.f32 %v2484_v10, %v2424_v42 }
 0x19e   :  { %v1456_v44 = vadd.f32 %v1703_v4, %v1296_v33  ;;  %v1299_v15 = vadd.f32 %v2035_v25, %v2468_v37  ;;  %v1952_v36 = vpop.f32.mrb[59].mxu1  ;;  %v1290_v29 = vpop.f32.mrb[59].mxu0  ;;  %v1719_v10 = vunpack.c.l.bf16 %v1753_v6 }
 0x19f   :  { %v1454_v40 = vadd.f32 %v1699_v39, %v1288_v48  ;;  %v1953_v22 = vadd.f32 %v1952_v36, %v1951_v19  ;;  %v1291_v41 = vadd.f32 %v1290_v29, %v2458_v13  ;;  %v2522_v1 = vadd.f32 %v1950_v12, %v1014_v18 }
 0x1a0   :  { %v1488_v50 = vmax.f32 %v1456_v44, 0.0  ;;  %v1457_v7 = vadd.f32 %v1704_v3, %v1299_v15 }
 0x1a1   :  { %v1486_v45 = vmax.f32 %v1454_v40, 0.0  ;;  %v1455_v46 = vadd.f32 %v1700_v56, %v1291_v41  ;;  %v2524_v51 = vadd.f32 %v1953_v22, %v1017_v54  ;;  %v1720_v22 = vunpack.c.h.bf16 %v1753_v6 }
 0x1a2   :  { %1520 = vst [vmem:[#allocation8 + $0x50] sm:$0xff] %v1488_v50  ;;  %v1489_v58 = vmax.f32 %v1457_v7, 0.0  ;;  %v1030_v41 = vadd.f32 %v2405_v60, %v2424_v42  ;;  %v1755_v60 = vld [vmem:[#allocation7 + $0x58] sm:$0xff]  }
 0x1a3   :  { %1518 = vst [vmem:[#allocation8 + $0x40] sm:$0xff] %v1486_v45  ;;  %v1487_v37 = vmax.f32 %v1455_v46, 0.0  ;;  %v1954_v49 = vpop.f32.mrb[60].mxu1  ;;  %v2038_v9 = vpop.f32.mrb[60].mxu0  ;;  %v1033_v46 = vadd.f32 %v2407_v2, %v2424_v42 }
 0x1a4   :  { %1521 = vst [vmem:[#allocation8 + $0x58] sm:$0xff] %v1489_v58  ;;  %v1312_v13 = vadd.f32 %v2038_v9, %v2486_v21  ;;  %v1955_v24 = vpop.f32.mrb[61].mxu1  ;;  %v1303_v61 = vpop.f32.mrb[61].mxu0 }
 0x1a5   :  { %1519 = vst [vmem:[#allocation8 + $0x48] sm:$0xff] %v1487_v37  ;;  %v1956_v62 = vadd.f32 %v1955_v24, %v1954_v49  ;;  %v1304_v0 = vadd.f32 %v1303_v61, %v2476_v59  ;;  %v1957_v35 = vpop.f32.mrb[62].mxu1  ;;  %v2039_v4 = vpop.f32.mrb[62].mxu0  ;;  %v1752_v59 = vld [vmem:[#allocation7 + $0x40] sm:$0xff]  }
 0x1a6   :  { %v1460_v55 = vadd.f32 %v1711_v27, %v1312_v13  ;;  %v1315_v39 = vadd.f32 %v2039_v4, %v2488_v28  ;;  %v1958_v21 = vpop.f32.mrb[63].mxu1  ;;  %v1306_v33 = vpop.f32.mrb[63].mxu0  ;;  %v1715_v36 = vunpack.c.l.bf16 %v1752_v59  ;;  %v1716_v45 = vunpack.c.h.bf16 %v1752_v59 }
 0x1a7   :  { %v1458_v16 = vadd.f32 %v1707_v53, %v1304_v0  ;;  %v1959_v17 = vadd.f32 %v1958_v21, %v1957_v35  ;;  %v1307_v3 = vadd.f32 %v1306_v33, %v2478_v34  ;;  %v1183_v18 = vadd.f32 %v1956_v62, %v1022_v11 }
 0x1a8   :  { %v1492_v12 = vmax.f32 %v1460_v55, 0.0  ;;  %v1461_v48 = vadd.f32 %v1712_v31, %v1315_v39  ;;  %v1727_v0 = vunpack.c.l.bf16 %v1755_v60  ;;  %v1728_v39 = vunpack.c.h.bf16 %v1755_v60 }
 0x1a9   :  { %v1490_v19 = vmax.f32 %v1458_v16, 0.0  ;;  %v1459_v25 = vadd.f32 %v1708_v52, %v1307_v3  ;;  %v1186_v56 = vadd.f32 %v1959_v17, %v1025_v5  ;;  %v1038_v21 = vadd.f32 %v2409_v8, %v2424_v42  ;;  %v1757_v8 = vld [vmem:[#allocation7 + $0x68] sm:$0xff]  }
 0x1aa   :  { %1524 = vst [vmem:[#allocation8 + $0x70] sm:$0xff] %v1492_v12  ;;  %v1493_v54 = vmax.f32 %v1461_v48, 0.0  ;;  %v1041_v12 = vadd.f32 %v2411_v14, %v2424_v42 }
 0x1ab   :  { %1522 = vst [vmem:[#allocation8 + $0x60] sm:$0xff] %v1490_v19  ;;  %v1491_v44 = vmax.f32 %v1459_v25, 0.0  ;;  %v1960_v28 = vpop.f32.mrb[64].mxu1  ;;  %v2042_v15 = vpop.f32.mrb[64].mxu0 }
 0x1ac   :  { %1525 = vst [vmem:[#allocation8 + $0x78] sm:$0xff] %v1493_v54  ;;  %v1328_v29 = vadd.f32 %v2042_v15, %v2510_v57  ;;  %v1961_v34 = vpop.f32.mrb[65].mxu1  ;;  %v1319_v40 = vpop.f32.mrb[65].mxu0 }
 0x1ad   :  { %1523 = vst [vmem:[#allocation8 + $0x68] sm:$0xff] %v1491_v44  ;;  %v1962_v47 = vadd.f32 %v1961_v34, %v1960_v28  ;;  %v1320_v50 = vadd.f32 %v1319_v40, %v2498_v63  ;;  %v1963_v7 = vpop.f32.mrb[66].mxu1  ;;  %v2043_v43 = vpop.f32.mrb[66].mxu0  ;;  %v1754_v63 = vld [vmem:[#allocation7 + $0x50] sm:$0xff]  }
 0x1ae   :  { %v1464_v58 = vadd.f32 %v1719_v10, %v1328_v29  ;;  %v1331_v27 = vadd.f32 %v2043_v43, %v2512_v23  ;;  %v1964_v57 = vpop.f32.mrb[67].mxu1  ;;  %v1322_v37 = vpop.f32.mrb[67].mxu0  ;;  %v1723_v52 = vunpack.c.l.bf16 %v1754_v63  ;;  %v1724_v6 = vunpack.c.h.bf16 %v1754_v63 }
 0x1af   :  { %v1462_v49 = vadd.f32 %v1715_v36, %v1320_v50  ;;  %v1965_v9 = vadd.f32 %v1964_v57, %v1963_v7  ;;  %v1323_v53 = vadd.f32 %v1322_v37, %v2500_v30  ;;  %v1191_v13 = vadd.f32 %v1962_v47, %v1030_v41  ;;  %v1756_v36 = vld [vmem:[#allocation7 + $0x60] sm:$0xff]  }
 0x1b0   :  { %v1496_v24 = vmax.f32 %v1464_v58, 0.0  ;;  %v1465_v61 = vadd.f32 %v1720_v22, %v1331_v27  ;;  %v1735_v22 = vunpack.c.l.bf16 %v1757_v8  ;;  %v1731_v47 = vunpack.c.l.bf16 %v1756_v36 }
 0x1b1   :  { %v1494_v31 = vmax.f32 %v1462_v49, 0.0  ;;  %v1463_v11 = vadd.f32 %v1716_v45, %v1323_v53  ;;  %v2542_v62 = vadd.f32 %v1965_v9, %v1033_v46  ;;  %v1736_v43 = vunpack.c.h.bf16 %v1757_v8 }
 0x1b2   :  { %1528 = vst [vmem:[#allocation8 + $0x90] sm:$0xff] %v1496_v24  ;;  %v1497_v2 = vmax.f32 %v1465_v61, 0.0  ;;  %v1046_v45 = vadd.f32 %v2413_v20, %v2424_v42  ;;  %v1732_v37 = vunpack.c.h.bf16 %v1756_v36  ;;  %v1049_v49 = vadd.f32 %v2415_v26, %v2424_v42 }
 0x1b3   :  { %1526 = vst [vmem:[#allocation8 + $0x80] sm:$0xff] %v1494_v31  ;;  %v1495_v23 = vmax.f32 %v1463_v11, 0.0  ;;  %v1966_v35 = vpop.f32.mrb[68].mxu1  ;;  %v2046_v4 = vpop.f32.mrb[68].mxu0 }
 0x1b4   :  { %1529 = vst [vmem:[#allocation8 + $0x98] sm:$0xff] %v1497_v2  ;;  %v1344_v5 = vadd.f32 %v2046_v4, %v1183_v18  ;;  %v1967_v30 = vpop.f32.mrb[69].mxu1  ;;  %v1335_v55 = vpop.f32.mrb[69].mxu0 }
 0x1b5   :  { %1527 = vst [vmem:[#allocation8 + $0x88] sm:$0xff] %v1495_v23  ;;  %v1968_v33 = vadd.f32 %v1967_v30, %v1966_v35  ;;  %v1336_v16 = vadd.f32 %v1335_v55, %v2522_v1  ;;  %v1969_v17 = vpop.f32.mrb[70].mxu1  ;;  %v2047_v3 = vpop.f32.mrb[70].mxu0  ;;  %v1759_v30 = vld [vmem:[#allocation7 + $0x78] sm:$0xff]  }
 0x1b6   :  { %v1468_v48 = vadd.f32 %v1727_v0, %v1344_v5  ;;  %v1347_v59 = vadd.f32 %v2047_v3, %v1186_v56  ;;  %v1970_v19 = vpop.f32.mrb[71].mxu1  ;;  %v1338_v18 = vpop.f32.mrb[71].mxu0  ;;  %v1758_v0 = vld [vmem:[#allocation7 + $0x70] sm:$0xff]  }
 0x1b7   :  { %v1466_v25 = vadd.f32 %v1723_v52, %v1336_v16  ;;  %v1971_v54 = vadd.f32 %v1970_v19, %v1969_v17  ;;  %v1339_v10 = vadd.f32 %v1338_v18, %v2524_v51  ;;  %v1199_v44 = vadd.f32 %v1968_v33, %v1038_v21 }
 0x1b8   :  { %v1500_v28 = vmax.f32 %v1468_v48, 0.0  ;;  %v1469_v15 = vadd.f32 %v1728_v39, %v1347_v59  ;;  %v1739_v55 = vunpack.c.l.bf16 %v1758_v0  ;;  %v1743_v48 = vunpack.c.l.bf16 %v1759_v30 }
 0x1b9   :  { %v1498_v1 = vmax.f32 %v1466_v25, 0.0  ;;  %v1467_v29 = vadd.f32 %v1724_v6, %v1339_v10  ;;  %v1202_v34 = vadd.f32 %v1971_v54, %v1041_v12  ;;  %v1740_v6 = vunpack.c.h.bf16 %v1758_v0 }
 0x1ba   :  { %1532 = vst [vmem:[#allocation8 + $0xb0] sm:$0xff] %v1500_v28  ;;  %v1501_v40 = vmax.f32 %v1469_v15, 0.0  ;;  %v1057_v12 = vadd.f32 %v2419_v38, %v2424_v42 }
 0x1bb   :  { %1530 = vst [vmem:[#allocation8 + $0xa0] sm:$0xff] %v1498_v1  ;;  %v1499_v14 = vmax.f32 %v1467_v29, 0.0  ;;  %v1972_v56 = vpop.f32.mrb[72].mxu1  ;;  %v2050_v41 = vpop.f32.mrb[72].mxu0 }
 0x1bc   :  { %1533 = vst [vmem:[#allocation8 + $0xb8] sm:$0xff] %v1501_v40  ;;  %v1360_v50 = vadd.f32 %v2050_v41, %v1199_v44  ;;  %v1973_v7 = vpop.f32.mrb[73].mxu1  ;;  %v1351_v51 = vpop.f32.mrb[73].mxu0  ;;  %v1744_v44 = vunpack.c.h.bf16 %v1759_v30 }
 0x1bd   :  { %1531 = vst [vmem:[#allocation8 + $0xa8] sm:$0xff] %v1499_v14  ;;  %v1974_v46 = vadd.f32 %v1973_v7, %v1972_v56  ;;  %v1352_v58 = vadd.f32 %v1351_v51, %v1191_v13  ;;  %v1975_v27 = vpop.f32.mrb[74].mxu1  ;;  %v2051_v57 = vpop.f32.mrb[74].mxu0 }
 0x1be   :  { %v1472_v9 = vadd.f32 %v1735_v22, %v1360_v50  ;;  %v1363_v53 = vadd.f32 %v2051_v57, %v1202_v34  ;;  %v1976_v60 = vpop.f32.mrb[75].mxu1  ;;  %v1354_v24 = vpop.f32.mrb[75].mxu0 }
 0x1bf   :  { %v1470_v61 = vadd.f32 %v1731_v47, %v1352_v58  ;;  %v1977_v63 = vadd.f32 %v1976_v60, %v1975_v27  ;;  %v1355_v31 = vadd.f32 %v1354_v24, %v2542_v62  ;;  %v1207_v11 = vadd.f32 %v1974_v46, %v1046_v45 }
 0x1c0   :  { %v1504_v2 = vmax.f32 %v1472_v9, 0.0  ;;  %v1473_v20 = vadd.f32 %v1736_v43, %v1363_v53  ;;  %v1054_v62 = vadd.f32 %v2417_v32, %v2424_v42 }
 0x1c1   :  { %v1502_v23 = vmax.f32 %v1470_v61, 0.0  ;;  %v1471_v13 = vadd.f32 %v1732_v37, %v1355_v31  ;;  %v1210_v35 = vadd.f32 %v1977_v63, %v1049_v49 }
 0x1c2   :  { %1536 = vst [vmem:[#allocation8 + $0xd0] sm:$0xff] %v1504_v2  ;;  %v1505_v4 = vmax.f32 %v1473_v20, 0.0 }
 0x1c3   :  { %1534 = vst [vmem:[#allocation8 + $0xc0] sm:$0xff] %v1502_v23  ;;  %v1503_v52 = vmax.f32 %v1471_v13, 0.0  ;;  %v1978_v26 = vpop.f32.mrb[76].mxu1  ;;  %v2054_v5 = vpop.f32.mrb[76].mxu0 }
 0x1c4   :  { %1537 = vst [vmem:[#allocation8 + $0xd8] sm:$0xff] %v1505_v4  ;;  %v1979_v39 = vpop.f32.mrb[77].mxu1  ;;  %v1367_v21 = vpop.f32.mrb[77].mxu0 }
 0x1c5   :  { %1535 = vst [vmem:[#allocation8 + $0xc8] sm:$0xff] %v1503_v52  ;;  %v1980_v33 = vadd.f32 %v1979_v39, %v1978_v26  ;;  %v1368_v16 = vadd.f32 %v1367_v21, %v1207_v11  ;;  %v1981_v17 = vpop.f32.mrb[78].mxu1  ;;  %v2055_v3 = vpop.f32.mrb[78].mxu0 }
 0x1c6   :  { %v1982_v59 = vpop.f32.mrb[79].mxu1  ;;  %v1370_v19 = vpop.f32.mrb[79].mxu0 }
 0x1c7   :  { %v1215_v18 = vadd.f32 %v1980_v33, %v1054_v62  ;;  %v1474_v25 = vadd.f32 %v1739_v55, %v1368_v16  ;;  %v1983_v54 = vadd.f32 %v1982_v59, %v1981_v17  ;;  %v1371_v10 = vadd.f32 %v1370_v19, %v1210_v35 }
 0x1c9   :  { %v1376_v8 = vadd.f32 %v2054_v5, %v1215_v18  ;;  %v1506_v28 = vmax.f32 %v1474_v25, 0.0  ;;  %v1218_v32 = vadd.f32 %v1983_v54, %v1057_v12  ;;  %v1475_v15 = vadd.f32 %v1740_v6, %v1371_v10 }
 0x1cb   :  { %v1476_v36 = vadd.f32 %v1743_v48, %v1376_v8  ;;  %1538 = vst [vmem:[#allocation8 + $0xe0] sm:$0xff] %v1506_v28  ;;  %v1379_v1 = vadd.f32 %v2055_v3, %v1218_v32  ;;  %v1507_v29 = vmax.f32 %v1475_v15, 0.0 }
 0x1cd   :  { %v1508_v34 = vmax.f32 %v1476_v36, 0.0  ;;  %v1477_v38 = vadd.f32 %v1744_v44, %v1379_v1  ;;  %1539 = vst [vmem:[#allocation8 + $0xe8] sm:$0xff] %v1507_v29 }
 0x1cf   :  { %1540 = vst [vmem:[#allocation8 + $0xf0] sm:$0xff] %v1508_v34  ;;  %v1509_v42 = vmax.f32 %v1477_v38, 0.0 }
 0x1d1   :  { %1541 = vst [vmem:[#allocation8 + $0xf8] sm:$0xff] %v1509_v42 }
 0x1d2   :  { %2311 = shalt.err (!%p2308_p0)
}
 0x1d3   :  { %s2312_s6 = scalar_lea.hbm %s2575_s4, 4096 }
 0x1d4   :  { %p2313_p1 = scmp.ne.s32.totalorder %s2575_s4, %s2312_s6  ;;  %p2316_p2 = scmp.lt.u32.totalorder %s2312_s6, %s2575_s4 }
 0x1d6   :  { %p2318_p3 = pnand %p2316_p2, %p2313_p1 }
 0x1d8   :  { %2321 = shalt.err (!%p2318_p3)
}
 0x1d9   :  { %s2336_s11 = smov 128   ;;  %s2337_s12 = smov 8  }
 0x1da   :  { %1553 = dma.vmem_to_hbm [thread:$0]  %s1548_s26, 4096, %s2575_s4, [#allocation4], %s2336_s11, %s2336_s11, %s2337_s12  }
 0x1db   :  { %2326 = dma.done.wait [#allocation4], 4096  }
 0x1dc   :  { %2327 = vsyncadd [#allocation4], 4294963200 }
 0x1dd   :  { %1557 = vsyncpa [#allocation3], 1 }
 0x1de   :  { %1558 = vsyncpa [#allocation6], 1 }
 0x1df   :  { %1559 = vsyncpa [#allocation4], 1 }

</bundles_post_ra>
